<compile_context>
chip_gen: v6e
topology: v6e:2x2x1
jax: 0.10.0
libtpu: 0.0.40
codegen_flags: <defaults>
</compile_context>

<pallas_src>
import functools
import math

import jax
import jax.numpy as jnp
from jax import lax
from jax.experimental import pallas as pl
from jax.experimental.pallas import tpu as pltpu

_VMEM_LIMIT_BYTES = 64 * 1024 * 1024    # cap handed to Mosaic
_VMEM_BUDGET_BYTES = 24 * 1024 * 1024   # headroom used by the tile heuristic


def _round_up(x, m):
    return ((x + m - 1) // m) * m


# ----------------------------------------------------------------------------
# Fused kernel: grouped Q/K/V projections + multi-head restricted-softmax
# attention for a (TB, TQ) tile of (batch, query-rows).
# ----------------------------------------------------------------------------
def _fused_multihead_kernel(q_ref, k_ref, v_ref,
                            wq_ref, wk_ref, wv_ref,
                            bq_ref, bk_ref, bv_ref,
                            o_ref, *, heads, groups):
    # q_ref: (TB, TQ, Cin)   k_ref/v_ref: (TB, Sk, Cin)
    # w*_ref: (g, Cin/g, Cout/g)   b*_ref: (1, Cout)   o_ref: (TB, TQ, Cout)
    Cin = q_ref.shape[-1]
    cin_g = Cin // groups
    cout_g = wq_ref.shape[-1]
    Cout = groups * cout_g
    D = Cout // heads
    scale = 1.0 / math.sqrt(D)

    def grouped_proj(x, w_ref, b_ref):
        # x: (TB, S, Cin) -> (TB, S, Cout) in f32; contraction only on channels
        # so the MXU sees a (TB*S, Cin/g) x (Cin/g, Cout/g) matmul per group.
        outs = []
        for gi in range(groups):
            xg = x[:, :, gi * cin_g:(gi + 1) * cin_g]      # static lane slice
            wg = w_ref[gi]                                  # (Cin/g, Cout/g)
            outs.append(lax.dot_general(
                xg, wg, (((2,), (0,)), ((), ())),
                preferred_element_type=jnp.float32))
        y = outs[0] if groups == 1 else jnp.concatenate(outs, axis=-1)
        return y + b_ref[...].astype(jnp.float32)

    q = grouped_proj(q_ref[...], wq_ref, bq_ref)   # (TB, TQ, Cout)
    k = grouped_proj(k_ref[...], wk_ref, bk_ref)   # (TB, Sk, Cout)
    v = grouped_proj(v_ref[...], wv_ref, bv_ref)   # (TB, Sk, Cout)

    dn_qk = (((2,), (2,)), ((0,), (0,)))  # (TB,TQ,D)x(TB,Sk,D) -> (TB,TQ,Sk)
    dn_av = (((2,), (1,)), ((0,), (0,)))  # (TB,TQ,Sk)x(TB,Sk,D) -> (TB,TQ,D)

    outs = []
    for h in range(heads):
        sl = slice(h * D, (h + 1) * D)
        qh = q[:, :, sl]
        kh = k[:, :, sl]
        vh = v[:, :, sl]
        score = lax.dot_general(qh, kh, dn_qk,
                                preferred_element_type=jnp.float32) * scale
        # restricted_softmax (margin = 0):
        #   m = clamp(max(score), min=0); e = exp(score - m)
        #   out = e / (sum(e) + exp(0 - m))
        m = jnp.maximum(jnp.max(score, axis=-1, keepdims=True), 0.0)
        e = jnp.exp(score - m)
        denom = jnp.sum(e, axis=-1, keepdims=True) + jnp.exp(-m)
        attn = e * pl.reciprocal(denom, approx=True)
        # dropout p=0 (module default) -> identity; no RNG needed.
        outs.append(lax.dot_general(attn, vh, dn_av,
                                    preferred_element_type=jnp.float32))
    y = outs[0] if heads == 1 else jnp.concatenate(outs, axis=-1)  # heads merged
    o_ref[...] = y.astype(o_ref.dtype)


# ----------------------------------------------------------------------------
# Host wrapper (only pads; no transposes, no intermediate HBM tensors)
# ----------------------------------------------------------------------------
def multihead_forward(params, query, key, value, *, heads, groups, tq=512):
    """query: (B, Sq, Cin), key/value: (B, Sk, Cin) -> (B, Sq, Cout)."""
    B, Sq, Cin = query.shape
    Sk = key.shape[1]
    g = groups
    cin_g = Cin // g
    cout_g = params["wq"].shape[-1]
    Cout = g * cout_g
    D = Cout // heads

    # Query tiling: keep the full Sq per step when it is modest, otherwise tile.
    if Sq <= 1024:
        TQ, Sq_pad = Sq, Sq
    else:
        TQ = min(tq, Sq)
        Sq_pad = _round_up(Sq, TQ)
    # TODO(synk): when Sq is tiled, K/V are re-projected per q-tile; for very
    # long Sq a two-pass (project-then-flash) variant would avoid that.

    # Fold batch elements per step under a VMEM budget (DNAConv: huge node
    # batch, tiny sequences -> this is the main throughput lever).
    per_b = ((TQ * Cin + 2 * Sk * Cin + TQ * Cout) * 2          # double-buffered IO
             + (TQ + 2 * Sk) * Cout + TQ * Sk + TQ * Cout + TQ * D) * 4
    TB = int(max(1, min(B, _VMEM_BUDGET_BYTES // max(per_b, 1))))
    B_pad = _round_up(B, TB)

    def pad(x, s_pad):
        pb, ps = B_pad - x.shape[0], s_pad - x.shape[1]
        if pb or ps:
            x = jnp.pad(x, ((0, pb), (0, ps), (0, 0)))
        return x

    q_in = pad(query, Sq_pad)
    k_in = pad(key, Sk)
    v_in = pad(value, Sk)

    kernel = functools.partial(_fused_multihead_kernel, heads=heads, groups=g)
    w_spec = pl.BlockSpec((g, cin_g, cout_g), lambda b, i: (0, 0, 0))
    b_spec = pl.BlockSpec((1, Cout), lambda b, i: (0, 0))

    out = pl.pallas_call(
        kernel,
        out_shape=jax.ShapeDtypeStruct((B_pad, Sq_pad, Cout), query.dtype),
        grid=(B_pad // TB, Sq_pad // TQ),
        in_specs=[
            pl.BlockSpec((TB, TQ, Cin), lambda b, i: (b, i, 0)),
            pl.BlockSpec((TB, Sk, Cin), lambda b, i: (b, 0, 0)),
            pl.BlockSpec((TB, Sk, Cin), lambda b, i: (b, 0, 0)),
            w_spec, w_spec, w_spec,
            b_spec, b_spec, b_spec,
        ],
        out_specs=pl.BlockSpec((TB, TQ, Cout), lambda b, i: (b, i, 0)),
        compiler_params=pltpu.CompilerParams(
            dimension_semantics=("parallel", "parallel"),
            vmem_limit_bytes=_VMEM_LIMIT_BYTES,
        ),
    )(q_in, k_in, v_in,
      params["wq"], params["wk"], params["wv"],
      params["bq"].reshape(1, Cout),
      params["bk"].reshape(1, Cout),
      params["bv"].reshape(1, Cout))
    return out[:B, :Sq]


def init_multihead_params(key, in_channels, out_channels, groups):
    fan = in_channels // groups
    bound = 1.0 / math.sqrt(fan)
    cin_g = in_channels // groups
    cout_g = out_channels // groups
    keys = jax.random.split(key, 6)
    mk_w = lambda k: jax.random.uniform(
        k, (groups, cin_g, cout_g), jnp.float32, minval=-bound, maxval=bound)
    mk_b = lambda k: jax.random.uniform(
        k, (out_channels,), jnp.float32, minval=-bound, maxval=bound)
    return {
        "wq": mk_w(keys[0]), "bq": mk_b(keys[1]),
        "wk": mk_w(keys[2]), "bk": mk_b(keys[3]),
        "wv": mk_w(keys[4]), "bv": mk_b(keys[5]),
    }


# ----------------------------------------------------------------------------
# Pure-JAX reference (mirrors the PyTorch module) for validation
# ----------------------------------------------------------------------------
def _reference_forward(params, query, key, value, *, heads, groups):
    def lin(x, w, b):
        B, S, Cin = x.shape
        g = groups
        cin_g = Cin // g
        cout_g = w.shape[-1]
        xg = x.reshape(B * S, g, cin_g).transpose(1, 0, 2)
        y = jnp.einsum("gnc,gcd->gnd", xg, w)
        y = y.transpose(1, 0, 2).reshape(B, S, g * cout_g)
        return y + b

    q = lin(query, params["wq"], params["bq"])
    k = lin(key, params["wk"], params["bk"])
    v = lin(value, params["wv"], params["bv"])
    B, Sq, Cout = q.shape
    Sk = k.shape[1]
    D = Cout // heads
    qh = q.reshape(B, Sq, heads, D).transpose(0, 2, 1, 3)
    kh = k.reshape(B, Sk, heads, D).transpose(0, 2, 1, 3)
    vh = v.reshape(B, Sk, heads, D).transpose(0, 2, 1, 3)
    score = jnp.einsum("bhqd,bhkd->bhqk", qh, kh) / math.sqrt(D)
    m = jnp.maximum(jnp.max(score, axis=-1, keepdims=True), 0.0)
    e = jnp.exp(score - m)
    attn = e / (jnp.sum(e, axis=-1, keepdims=True) + jnp.exp(-m))
    out = jnp.einsum("bhqk,bhkd->bhqd", attn, vh)
    return out.transpose(0, 2, 1, 3).reshape(B, Sq, Cout)


if __name__ == "__main__":
    # Small instantiation consistent with MultiHead's constraints:
    #   in_channels % heads == 0, in_channels % groups == 0,
    #   max(groups, heads) % min(groups, heads) == 0
    B, S = 2, 16
    in_channels, out_channels = 32, 32
    heads, groups = 4, 2

    root = jax.random.PRNGKey(0)
    k_param, k_q, k_k, k_v = jax.random.split(root, 4)

    params = init_multihead_params(k_param, in_channels, out_channels, groups)
    query = jax.random.normal(k_q, (B, S, in_channels), jnp.float32)
    key_t = jax.random.normal(k_k, (B, S, in_channels), jnp.float32)
    value = jax.random.normal(k_v, (B, S, in_channels), jnp.float32)

    out = multihead_forward(params, query, key_t, value, heads=heads, groups=groups)
    out = jax.block_until_ready(out)
    assert out.shape == (B, S, out_channels)

    ref = _reference_forward(params, query, key_t, value, heads=heads, groups=groups)
    # loose tolerance: softmax denom uses the EUP approximate reciprocal
    assert jnp.allclose(out, ref, rtol=5e-2, atol=5e-2), \
        f"max abs err {float(jnp.max(jnp.abs(out - ref)))}"
    print("KERNEL_OK")
</pallas_src>

<mosaic_0001>
module attributes {stable_mosaic.version = 11 : i64} {
  func.func @_fused_multihead_kernel(%arg0: i32, %arg1: i32, %arg2: memref<2x16x32xf32, #tpu.memory_space<vmem>>, %arg3: memref<2x16x32xf32, #tpu.memory_space<vmem>>, %arg4: memref<2x16x32xf32, #tpu.memory_space<vmem>>, %arg5: memref<2x16x16xf32, #tpu.memory_space<vmem>>, %arg6: memref<2x16x16xf32, #tpu.memory_space<vmem>>, %arg7: memref<2x16x16xf32, #tpu.memory_space<vmem>>, %arg8: memref<1x32xf32, #tpu.memory_space<vmem>>, %arg9: memref<1x32xf32, #tpu.memory_space<vmem>>, %arg10: memref<1x32xf32, #tpu.memory_space<vmem>>, %arg11: memref<2x16x32xf32, #tpu.memory_space<vmem>>) attributes {dimension_semantics = [#tpu.dimension_semantics<parallel>, #tpu.dimension_semantics<parallel>], iteration_bounds = array<i64: 1, 1>, scalar_prefetch = 0 : i64, scratch_operands = 0 : i64, tpu.core_type = #tpu.core_type<tc>, window_params = [{transform_indices = @transform_0, window_bounds = array<i64: 2, 16, 32>}, {transform_indices = @transform_1, window_bounds = array<i64: 2, 16, 32>}, {transform_indices = @transform_2, window_bounds = array<i64: 2, 16, 32>}, {pipeline_mode = #tpu.pipeline_mode<synchronous>, transform_indices = @transform_3, window_bounds = array<i64: 2, 16, 16>}, {pipeline_mode = #tpu.pipeline_mode<synchronous>, transform_indices = @transform_4, window_bounds = array<i64: 2, 16, 16>}, {pipeline_mode = #tpu.pipeline_mode<synchronous>, transform_indices = @transform_5, window_bounds = array<i64: 2, 16, 16>}, {pipeline_mode = #tpu.pipeline_mode<synchronous>, transform_indices = @transform_6, window_bounds = array<i64: 1, 32>}, {pipeline_mode = #tpu.pipeline_mode<synchronous>, transform_indices = @transform_7, window_bounds = array<i64: 1, 32>}, {pipeline_mode = #tpu.pipeline_mode<synchronous>, transform_indices = @transform_8, window_bounds = array<i64: 1, 32>}, {transform_indices = @transform_9, window_bounds = array<i64: 2, 16, 32>}]} {
    %c0 = arith.constant 0 : index
    %c0_0 = arith.constant 0 : index
    %c0_1 = arith.constant 0 : index
    %0 = vector.load %arg2[%c0, %c0_0, %c0_1] : memref<2x16x32xf32, #tpu.memory_space<vmem>>, vector<2x16x32xf32>
    %1 = vector.extract_strided_slice %0 {offsets = [0, 0, 0], sizes = [2, 16, 16], strides = [1, 1, 1]} : vector<2x16x32xf32> to vector<2x16x16xf32>
    %c0_2 = arith.constant 0 : index
    %c0_3 = arith.constant 0 : index
    %c0_4 = arith.constant 0 : index
    %2 = vector.load %arg5[%c0_2, %c0_3, %c0_4] : memref<2x16x16xf32, #tpu.memory_space<vmem>>, vector<1x16x16xf32>
    %3 = vector.shape_cast %2 : vector<1x16x16xf32> to vector<16x16xf32>
    %cst = arith.constant dense<0.000000e+00> : vector<2x16x16xf32>
    %4 = tpu.matmul %1, %3, %cst {dimension_numbers = #tpu.dot_dimension_numbers<[2], [0], [0, 1], [1], [0, 0, 0, 1, 1, 1], [], []>} : vector<2x16x16xf32>, vector<16x16xf32>, vector<2x16x16xf32> -> vector<2x16x16xf32>
    %5 = vector.extract_strided_slice %0 {offsets = [0, 0, 16], sizes = [2, 16, 16], strides = [1, 1, 1]} : vector<2x16x32xf32> to vector<2x16x16xf32>
    %c1 = arith.constant 1 : index
    %c0_5 = arith.constant 0 : index
    %c0_6 = arith.constant 0 : index
    %6 = vector.load %arg5[%c1, %c0_5, %c0_6] : memref<2x16x16xf32, #tpu.memory_space<vmem>>, vector<1x16x16xf32>
    %7 = vector.shape_cast %6 : vector<1x16x16xf32> to vector<16x16xf32>
    %cst_7 = arith.constant dense<0.000000e+00> : vector<2x16x16xf32>
    %8 = tpu.matmul %5, %7, %cst_7 {dimension_numbers = #tpu.dot_dimension_numbers<[2], [0], [0, 1], [1], [0, 0, 0, 1, 1, 1], [], []>} : vector<2x16x16xf32>, vector<16x16xf32>, vector<2x16x16xf32> -> vector<2x16x16xf32>
    %9 = tpu.concatenate %4, %8 in 2 : vector<2x16x16xf32>, vector<2x16x16xf32> -> vector<2x16x32xf32>
    %c0_8 = arith.constant 0 : index
    %c0_9 = arith.constant 0 : index
    %10 = vector.load %arg8[%c0_8, %c0_9] : memref<1x32xf32, #tpu.memory_space<vmem>>, vector<1x32xf32>
    %11 = vector.shape_cast %10 : vector<1x32xf32> to vector<1x1x32xf32>
    %12 = vector.broadcast %11 : vector<1x1x32xf32> to vector<2x16x32xf32>
    %13 = arith.addf %9, %12 : vector<2x16x32xf32>
    %c0_10 = arith.constant 0 : index
    %c0_11 = arith.constant 0 : index
    %c0_12 = arith.constant 0 : index
    %14 = vector.load %arg3[%c0_10, %c0_11, %c0_12] : memref<2x16x32xf32, #tpu.memory_space<vmem>>, vector<2x16x32xf32>
    %15 = vector.extract_strided_slice %14 {offsets = [0, 0, 0], sizes = [2, 16, 16], strides = [1, 1, 1]} : vector<2x16x32xf32> to vector<2x16x16xf32>
    %c0_13 = arith.constant 0 : index
    %c0_14 = arith.constant 0 : index
    %c0_15 = arith.constant 0 : index
    %16 = vector.load %arg6[%c0_13, %c0_14, %c0_15] : memref<2x16x16xf32, #tpu.memory_space<vmem>>, vector<1x16x16xf32>
    %17 = vector.shape_cast %16 : vector<1x16x16xf32> to vector<16x16xf32>
    %cst_16 = arith.constant dense<0.000000e+00> : vector<2x16x16xf32>
    %18 = tpu.matmul %15, %17, %cst_16 {dimension_numbers = #tpu.dot_dimension_numbers<[2], [0], [0, 1], [1], [0, 0, 0, 1, 1, 1], [], []>} : vector<2x16x16xf32>, vector<16x16xf32>, vector<2x16x16xf32> -> vector<2x16x16xf32>
    %19 = vector.extract_strided_slice %14 {offsets = [0, 0, 16], sizes = [2, 16, 16], strides = [1, 1, 1]} : vector<2x16x32xf32> to vector<2x16x16xf32>
    %c1_17 = arith.constant 1 : index
    %c0_18 = arith.constant 0 : index
    %c0_19 = arith.constant 0 : index
    %20 = vector.load %arg6[%c1_17, %c0_18, %c0_19] : memref<2x16x16xf32, #tpu.memory_space<vmem>>, vector<1x16x16xf32>
    %21 = vector.shape_cast %20 : vector<1x16x16xf32> to vector<16x16xf32>
    %cst_20 = arith.constant dense<0.000000e+00> : vector<2x16x16xf32>
    %22 = tpu.matmul %19, %21, %cst_20 {dimension_numbers = #tpu.dot_dimension_numbers<[2], [0], [0, 1], [1], [0, 0, 0, 1, 1, 1], [], []>} : vector<2x16x16xf32>, vector<16x16xf32>, vector<2x16x16xf32> -> vector<2x16x16xf32>
    %23 = tpu.concatenate %18, %22 in 2 : vector<2x16x16xf32>, vector<2x16x16xf32> -> vector<2x16x32xf32>
    %c0_21 = arith.constant 0 : index
    %c0_22 = arith.constant 0 : index
    %24 = vector.load %arg9[%c0_21, %c0_22] : memref<1x32xf32, #tpu.memory_space<vmem>>, vector<1x32xf32>
    %25 = vector.shape_cast %24 : vector<1x32xf32> to vector<1x1x32xf32>
    %26 = vector.broadcast %25 : vector<1x1x32xf32> to vector<2x16x32xf32>
    %27 = arith.addf %23, %26 : vector<2x16x32xf32>
    %c0_23 = arith.constant 0 : index
    %c0_24 = arith.constant 0 : index
    %c0_25 = arith.constant 0 : index
    %28 = vector.load %arg4[%c0_23, %c0_24, %c0_25] : memref<2x16x32xf32, #tpu.memory_space<vmem>>, vector<2x16x32xf32>
    %29 = vector.extract_strided_slice %28 {offsets = [0, 0, 0], sizes = [2, 16, 16], strides = [1, 1, 1]} : vector<2x16x32xf32> to vector<2x16x16xf32>
    %c0_26 = arith.constant 0 : index
    %c0_27 = arith.constant 0 : index
    %c0_28 = arith.constant 0 : index
    %30 = vector.load %arg7[%c0_26, %c0_27, %c0_28] : memref<2x16x16xf32, #tpu.memory_space<vmem>>, vector<1x16x16xf32>
    %31 = vector.shape_cast %30 : vector<1x16x16xf32> to vector<16x16xf32>
    %cst_29 = arith.constant dense<0.000000e+00> : vector<2x16x16xf32>
    %32 = tpu.matmul %29, %31, %cst_29 {dimension_numbers = #tpu.dot_dimension_numbers<[2], [0], [0, 1], [1], [0, 0, 0, 1, 1, 1], [], []>} : vector<2x16x16xf32>, vector<16x16xf32>, vector<2x16x16xf32> -> vector<2x16x16xf32>
    %33 = vector.extract_strided_slice %28 {offsets = [0, 0, 16], sizes = [2, 16, 16], strides = [1, 1, 1]} : vector<2x16x32xf32> to vector<2x16x16xf32>
    %c1_30 = arith.constant 1 : index
    %c0_31 = arith.constant 0 : index
    %c0_32 = arith.constant 0 : index
    %34 = vector.load %arg7[%c1_30, %c0_31, %c0_32] : memref<2x16x16xf32, #tpu.memory_space<vmem>>, vector<1x16x16xf32>
    %35 = vector.shape_cast %34 : vector<1x16x16xf32> to vector<16x16xf32>
    %cst_33 = arith.constant dense<0.000000e+00> : vector<2x16x16xf32>
    %36 = tpu.matmul %33, %35, %cst_33 {dimension_numbers = #tpu.dot_dimension_numbers<[2], [0], [0, 1], [1], [0, 0, 0, 1, 1, 1], [], []>} : vector<2x16x16xf32>, vector<16x16xf32>, vector<2x16x16xf32> -> vector<2x16x16xf32>
    %37 = tpu.concatenate %32, %36 in 2 : vector<2x16x16xf32>, vector<2x16x16xf32> -> vector<2x16x32xf32>
    %c0_34 = arith.constant 0 : index
    %c0_35 = arith.constant 0 : index
    %38 = vector.load %arg10[%c0_34, %c0_35] : memref<1x32xf32, #tpu.memory_space<vmem>>, vector<1x32xf32>
    %39 = vector.shape_cast %38 : vector<1x32xf32> to vector<1x1x32xf32>
    %40 = vector.broadcast %39 : vector<1x1x32xf32> to vector<2x16x32xf32>
    %41 = arith.addf %37, %40 : vector<2x16x32xf32>
    %42 = vector.extract_strided_slice %13 {offsets = [0, 0, 0], sizes = [2, 16, 8], strides = [1, 1, 1]} : vector<2x16x32xf32> to vector<2x16x8xf32>
    %43 = vector.extract_strided_slice %27 {offsets = [0, 0, 0], sizes = [2, 16, 8], strides = [1, 1, 1]} : vector<2x16x32xf32> to vector<2x16x8xf32>
    %44 = vector.extract_strided_slice %41 {offsets = [0, 0, 0], sizes = [2, 16, 8], strides = [1, 1, 1]} : vector<2x16x32xf32> to vector<2x16x8xf32>
    %cst_36 = arith.constant dense<0.000000e+00> : vector<2x16x16xf32>
    %45 = tpu.matmul %42, %43, %cst_36 {dimension_numbers = #tpu.dot_dimension_numbers<[2], [2], [1], [1], [0, 0, 0, 1, 1, 1], [0], [0]>} : vector<2x16x8xf32>, vector<2x16x8xf32>, vector<2x16x16xf32> -> vector<2x16x16xf32>
    %cst_37 = arith.constant 0.353553385 : f32
    %46 = vector.broadcast %cst_37 : f32 to vector<2x16x16xf32>
    %47 = arith.mulf %45, %46 : vector<2x16x16xf32>
    %cst_38 = arith.constant dense<0xFF800000> : vector<2x16xf32>
    %48 = vector.multi_reduction <maximumf>, %47, %cst_38 [2] : vector<2x16x16xf32> to vector<2x16xf32>
    %49 = vector.shape_cast %48 : vector<2x16xf32> to vector<2x16x1xf32>
    %cst_39 = arith.constant 0.000000e+00 : f32
    %50 = vector.broadcast %cst_39 : f32 to vector<2x16x1xf32>
    %51 = arith.maximumf %49, %50 : vector<2x16x1xf32>
    %52 = vector.broadcast %51 : vector<2x16x1xf32> to vector<2x16x16xf32>
    %53 = arith.subf %47, %52 : vector<2x16x16xf32>
    %54 = math.exp %53 : vector<2x16x16xf32>
    %cst_40 = arith.constant dense<0.000000e+00> : vector<2x16xf32>
    %55 = vector.multi_reduction <add>, %54, %cst_40 [2] : vector<2x16x16xf32> to vector<2x16xf32>
    %56 = vector.shape_cast %55 : vector<2x16xf32> to vector<2x16x1xf32>
    %cst_41 = arith.constant 0.000000e+00 : f32
    %57 = vector.broadcast %cst_41 : f32 to vector<2x16x1xf32>
    %58 = arith.subf %57, %51 : vector<2x16x1xf32>
    %59 = math.exp %58 : vector<2x16x1xf32>
    %60 = arith.addf %56, %59 : vector<2x16x1xf32>
    %61 = tpu.reciprocal %60 {approx = true} : vector<2x16x1xf32> -> vector<2x16x1xf32>
    %62 = vector.broadcast %61 : vector<2x16x1xf32> to vector<2x16x16xf32>
    %63 = arith.mulf %54, %62 : vector<2x16x16xf32>
    %cst_42 = arith.constant dense<0.000000e+00> : vector<2x16x8xf32>
    %64 = tpu.matmul %63, %44, %cst_42 {dimension_numbers = #tpu.dot_dimension_numbers<[2], [1], [1], [2], [0, 0, 0, 1, 1, 2], [0], [0]>} : vector<2x16x16xf32>, vector<2x16x8xf32>, vector<2x16x8xf32> -> vector<2x16x8xf32>
    %65 = vector.extract_strided_slice %13 {offsets = [0, 0, 8], sizes = [2, 16, 8], strides = [1, 1, 1]} : vector<2x16x32xf32> to vector<2x16x8xf32>
    %66 = vector.extract_strided_slice %27 {offsets = [0, 0, 8], sizes = [2, 16, 8], strides = [1, 1, 1]} : vector<2x16x32xf32> to vector<2x16x8xf32>
    %67 = vector.extract_strided_slice %41 {offsets = [0, 0, 8], sizes = [2, 16, 8], strides = [1, 1, 1]} : vector<2x16x32xf32> to vector<2x16x8xf32>
    %cst_43 = arith.constant dense<0.000000e+00> : vector<2x16x16xf32>
    %68 = tpu.matmul %65, %66, %cst_43 {dimension_numbers = #tpu.dot_dimension_numbers<[2], [2], [1], [1], [0, 0, 0, 1, 1, 1], [0], [0]>} : vector<2x16x8xf32>, vector<2x16x8xf32>, vector<2x16x16xf32> -> vector<2x16x16xf32>
    %cst_44 = arith.constant 0.353553385 : f32
    %69 = vector.broadcast %cst_44 : f32 to vector<2x16x16xf32>
    %70 = arith.mulf %68, %69 : vector<2x16x16xf32>
    %cst_45 = arith.constant dense<0xFF800000> : vector<2x16xf32>
    %71 = vector.multi_reduction <maximumf>, %70, %cst_45 [2] : vector<2x16x16xf32> to vector<2x16xf32>
    %72 = vector.shape_cast %71 : vector<2x16xf32> to vector<2x16x1xf32>
    %cst_46 = arith.constant 0.000000e+00 : f32
    %73 = vector.broadcast %cst_46 : f32 to vector<2x16x1xf32>
    %74 = arith.maximumf %72, %73 : vector<2x16x1xf32>
    %75 = vector.broadcast %74 : vector<2x16x1xf32> to vector<2x16x16xf32>
    %76 = arith.subf %70, %75 : vector<2x16x16xf32>
    %77 = math.exp %76 : vector<2x16x16xf32>
    %cst_47 = arith.constant dense<0.000000e+00> : vector<2x16xf32>
    %78 = vector.multi_reduction <add>, %77, %cst_47 [2] : vector<2x16x16xf32> to vector<2x16xf32>
    %79 = vector.shape_cast %78 : vector<2x16xf32> to vector<2x16x1xf32>
    %cst_48 = arith.constant 0.000000e+00 : f32
    %80 = vector.broadcast %cst_48 : f32 to vector<2x16x1xf32>
    %81 = arith.subf %80, %74 : vector<2x16x1xf32>
    %82 = math.exp %81 : vector<2x16x1xf32>
    %83 = arith.addf %79, %82 : vector<2x16x1xf32>
    %84 = tpu.reciprocal %83 {approx = true} : vector<2x16x1xf32> -> vector<2x16x1xf32>
    %85 = vector.broadcast %84 : vector<2x16x1xf32> to vector<2x16x16xf32>
    %86 = arith.mulf %77, %85 : vector<2x16x16xf32>
    %cst_49 = arith.constant dense<0.000000e+00> : vector<2x16x8xf32>
    %87 = tpu.matmul %86, %67, %cst_49 {dimension_numbers = #tpu.dot_dimension_numbers<[2], [1], [1], [2], [0, 0, 0, 1, 1, 2], [0], [0]>} : vector<2x16x16xf32>, vector<2x16x8xf32>, vector<2x16x8xf32> -> vector<2x16x8xf32>
    %88 = vector.extract_strided_slice %13 {offsets = [0, 0, 16], sizes = [2, 16, 8], strides = [1, 1, 1]} : vector<2x16x32xf32> to vector<2x16x8xf32>
    %89 = vector.extract_strided_slice %27 {offsets = [0, 0, 16], sizes = [2, 16, 8], strides = [1, 1, 1]} : vector<2x16x32xf32> to vector<2x16x8xf32>
    %90 = vector.extract_strided_slice %41 {offsets = [0, 0, 16], sizes = [2, 16, 8], strides = [1, 1, 1]} : vector<2x16x32xf32> to vector<2x16x8xf32>
    %cst_50 = arith.constant dense<0.000000e+00> : vector<2x16x16xf32>
    %91 = tpu.matmul %88, %89, %cst_50 {dimension_numbers = #tpu.dot_dimension_numbers<[2], [2], [1], [1], [0, 0, 0, 1, 1, 1], [0], [0]>} : vector<2x16x8xf32>, vector<2x16x8xf32>, vector<2x16x16xf32> -> vector<2x16x16xf32>
    %cst_51 = arith.constant 0.353553385 : f32
    %92 = vector.broadcast %cst_51 : f32 to vector<2x16x16xf32>
    %93 = arith.mulf %91, %92 : vector<2x16x16xf32>
    %cst_52 = arith.constant dense<0xFF800000> : vector<2x16xf32>
    %94 = vector.multi_reduction <maximumf>, %93, %cst_52 [2] : vector<2x16x16xf32> to vector<2x16xf32>
    %95 = vector.shape_cast %94 : vector<2x16xf32> to vector<2x16x1xf32>
    %cst_53 = arith.constant 0.000000e+00 : f32
    %96 = vector.broadcast %cst_53 : f32 to vector<2x16x1xf32>
    %97 = arith.maximumf %95, %96 : vector<2x16x1xf32>
    %98 = vector.broadcast %97 : vector<2x16x1xf32> to vector<2x16x16xf32>
    %99 = arith.subf %93, %98 : vector<2x16x16xf32>
    %100 = math.exp %99 : vector<2x16x16xf32>
    %cst_54 = arith.constant dense<0.000000e+00> : vector<2x16xf32>
    %101 = vector.multi_reduction <add>, %100, %cst_54 [2] : vector<2x16x16xf32> to vector<2x16xf32>
    %102 = vector.shape_cast %101 : vector<2x16xf32> to vector<2x16x1xf32>
    %cst_55 = arith.constant 0.000000e+00 : f32
    %103 = vector.broadcast %cst_55 : f32 to vector<2x16x1xf32>
    %104 = arith.subf %103, %97 : vector<2x16x1xf32>
    %105 = math.exp %104 : vector<2x16x1xf32>
    %106 = arith.addf %102, %105 : vector<2x16x1xf32>
    %107 = tpu.reciprocal %106 {approx = true} : vector<2x16x1xf32> -> vector<2x16x1xf32>
    %108 = vector.broadcast %107 : vector<2x16x1xf32> to vector<2x16x16xf32>
    %109 = arith.mulf %100, %108 : vector<2x16x16xf32>
    %cst_56 = arith.constant dense<0.000000e+00> : vector<2x16x8xf32>
    %110 = tpu.matmul %109, %90, %cst_56 {dimension_numbers = #tpu.dot_dimension_numbers<[2], [1], [1], [2], [0, 0, 0, 1, 1, 2], [0], [0]>} : vector<2x16x16xf32>, vector<2x16x8xf32>, vector<2x16x8xf32> -> vector<2x16x8xf32>
    %111 = vector.extract_strided_slice %13 {offsets = [0, 0, 24], sizes = [2, 16, 8], strides = [1, 1, 1]} : vector<2x16x32xf32> to vector<2x16x8xf32>
    %112 = vector.extract_strided_slice %27 {offsets = [0, 0, 24], sizes = [2, 16, 8], strides = [1, 1, 1]} : vector<2x16x32xf32> to vector<2x16x8xf32>
    %113 = vector.extract_strided_slice %41 {offsets = [0, 0, 24], sizes = [2, 16, 8], strides = [1, 1, 1]} : vector<2x16x32xf32> to vector<2x16x8xf32>
    %cst_57 = arith.constant dense<0.000000e+00> : vector<2x16x16xf32>
    %114 = tpu.matmul %111, %112, %cst_57 {dimension_numbers = #tpu.dot_dimension_numbers<[2], [2], [1], [1], [0, 0, 0, 1, 1, 1], [0], [0]>} : vector<2x16x8xf32>, vector<2x16x8xf32>, vector<2x16x16xf32> -> vector<2x16x16xf32>
    %cst_58 = arith.constant 0.353553385 : f32
    %115 = vector.broadcast %cst_58 : f32 to vector<2x16x16xf32>
    %116 = arith.mulf %114, %115 : vector<2x16x16xf32>
    %cst_59 = arith.constant dense<0xFF800000> : vector<2x16xf32>
    %117 = vector.multi_reduction <maximumf>, %116, %cst_59 [2] : vector<2x16x16xf32> to vector<2x16xf32>
    %118 = vector.shape_cast %117 : vector<2x16xf32> to vector<2x16x1xf32>
    %cst_60 = arith.constant 0.000000e+00 : f32
    %119 = vector.broadcast %cst_60 : f32 to vector<2x16x1xf32>
    %120 = arith.maximumf %118, %119 : vector<2x16x1xf32>
    %121 = vector.broadcast %120 : vector<2x16x1xf32> to vector<2x16x16xf32>
    %122 = arith.subf %116, %121 : vector<2x16x16xf32>
    %123 = math.exp %122 : vector<2x16x16xf32>
    %cst_61 = arith.constant dense<0.000000e+00> : vector<2x16xf32>
    %124 = vector.multi_reduction <add>, %123, %cst_61 [2] : vector<2x16x16xf32> to vector<2x16xf32>
    %125 = vector.shape_cast %124 : vector<2x16xf32> to vector<2x16x1xf32>
    %cst_62 = arith.constant 0.000000e+00 : f32
    %126 = vector.broadcast %cst_62 : f32 to vector<2x16x1xf32>
    %127 = arith.subf %126, %120 : vector<2x16x1xf32>
    %128 = math.exp %127 : vector<2x16x1xf32>
    %129 = arith.addf %125, %128 : vector<2x16x1xf32>
    %130 = tpu.reciprocal %129 {approx = true} : vector<2x16x1xf32> -> vector<2x16x1xf32>
    %131 = vector.broadcast %130 : vector<2x16x1xf32> to vector<2x16x16xf32>
    %132 = arith.mulf %123, %131 : vector<2x16x16xf32>
    %cst_63 = arith.constant dense<0.000000e+00> : vector<2x16x8xf32>
    %133 = tpu.matmul %132, %113, %cst_63 {dimension_numbers = #tpu.dot_dimension_numbers<[2], [1], [1], [2], [0, 0, 0, 1, 1, 2], [0], [0]>} : vector<2x16x16xf32>, vector<2x16x8xf32>, vector<2x16x8xf32> -> vector<2x16x8xf32>
    %134 = tpu.concatenate %64, %87, %110, %133 in 2 : vector<2x16x8xf32>, vector<2x16x8xf32>, vector<2x16x8xf32>, vector<2x16x8xf32> -> vector<2x16x32xf32>
    %c0_64 = arith.constant 0 : index
    %c0_65 = arith.constant 0 : index
    %c0_66 = arith.constant 0 : index
    %135 = vector.load %arg11[%c0_64, %c0_65, %c0_66] : memref<2x16x32xf32, #tpu.memory_space<vmem>>, vector<2x16x32xf32>
    tpu.vector_store %arg11[%c0_64, %c0_65, %c0_66], %134 {strides = array<i32>} : memref<2x16x32xf32, #tpu.memory_space<vmem>>, vector<2x16x32xf32>,
    return
  }
  func.func @transform_0(%arg0: i32, %arg1: i32) -> (i32, i32, i32) {
    %c0_i32 = arith.constant 0 : i32
    %c0_i32_0 = arith.constant 0 : i32
    return %arg0, %arg1, %c0_i32 : i32, i32, i32
  }
  func.func @transform_1(%arg0: i32, %arg1: i32) -> (i32, i32, i32) {
    %c0_i32 = arith.constant 0 : i32
    %c0_i32_0 = arith.constant 0 : i32
    %c0_i32_1 = arith.constant 0 : i32
    return %arg0, %c0_i32, %c0_i32_0 : i32, i32, i32
  }
  func.func @transform_2(%arg0: i32, %arg1: i32) -> (i32, i32, i32) {
    %c0_i32 = arith.constant 0 : i32
    %c0_i32_0 = arith.constant 0 : i32
    %c0_i32_1 = arith.constant 0 : i32
    return %arg0, %c0_i32, %c0_i32_0 : i32, i32, i32
  }
  func.func @transform_3(%arg0: i32, %arg1: i32) -> (i32, i32, i32) {
    %c0_i32 = arith.constant 0 : i32
    %c0_i32_0 = arith.constant 0 : i32
    %c0_i32_1 = arith.constant 0 : i32
    %c0_i32_2 = arith.constant 0 : i32
    return %c0_i32, %c0_i32_0, %c0_i32_1 : i32, i32, i32
  }
  func.func @transform_4(%arg0: i32, %arg1: i32) -> (i32, i32, i32) {
    %c0_i32 = arith.constant 0 : i32
    %c0_i32_0 = arith.constant 0 : i32
    %c0_i32_1 = arith.constant 0 : i32
    %c0_i32_2 = arith.constant 0 : i32
    return %c0_i32, %c0_i32_0, %c0_i32_1 : i32, i32, i32
  }
  func.func @transform_5(%arg0: i32, %arg1: i32) -> (i32, i32, i32) {
    %c0_i32 = arith.constant 0 : i32
    %c0_i32_0 = arith.constant 0 : i32
    %c0_i32_1 = arith.constant 0 : i32
    %c0_i32_2 = arith.constant 0 : i32
    return %c0_i32, %c0_i32_0, %c0_i32_1 : i32, i32, i32
  }
  func.func @transform_6(%arg0: i32, %arg1: i32) -> (i32, i32) {
    %c0_i32 = arith.constant 0 : i32
    %c0_i32_0 = arith.constant 0 : i32
    %c0_i32_1 = arith.constant 0 : i32
    return %c0_i32, %c0_i32_0 : i32, i32
  }
  func.func @transform_7(%arg0: i32, %arg1: i32) -> (i32, i32) {
    %c0_i32 = arith.constant 0 : i32
    %c0_i32_0 = arith.constant 0 : i32
    %c0_i32_1 = arith.constant 0 : i32
    return %c0_i32, %c0_i32_0 : i32, i32
  }
  func.func @transform_8(%arg0: i32, %arg1: i32) -> (i32, i32) {
    %c0_i32 = arith.constant 0 : i32
    %c0_i32_0 = arith.constant 0 : i32
    %c0_i32_1 = arith.constant 0 : i32
    return %c0_i32, %c0_i32_0 : i32, i32
  }
  func.func @transform_9(%arg0: i32, %arg1: i32) -> (i32, i32, i32) {
    %c0_i32 = arith.constant 0 : i32
    %c0_i32_0 = arith.constant 0 : i32
    return %arg0, %arg1, %c0_i32 : i32, i32, i32
  }
}

</mosaic_0001>

<bundles_post_ra>
// kernel: tpu_custom_call.1
= control target key start
LH: loop header
LB: loop body
LE: loop exit
PB: predicated region body
PF: predicated region fallthrough
CT: control target
= control target key end

     0   :  { %14 = vsyncpa [#allocation3], 0  ;;  %s3681_s0 = inlined_call_operand.hbm [shape: f32[2,16,32], index: 0, kind: input, shape index: {}]   ;;  %s3682_s1 = inlined_call_operand.hbm [shape: f32[2,16,32], index: 1, kind: input, shape index: {}]   ;;  %s3683_s2 = inlined_call_operand.hbm [shape: f32[2,16,32], index: 2, kind: input, shape index: {}]   ;;  %s3684_s3 = inlined_call_operand.hbm [shape: f32[2,16,16], index: 3, kind: input, shape index: {}]   ;;  %s3685_s4 = inlined_call_operand.hbm [shape: f32[2,16,16], index: 4, kind: input, shape index: {}]   ;;  %s3686_s5 = inlined_call_operand.hbm [shape: f32[2,16,16], index: 5, kind: input, shape index: {}]   ;;  %s3687_s6 = inlined_call_operand.vmem [shape: f32[1,32], index: 6, kind: input, shape index: {}]   ;;  %s3688_s7 = inlined_call_operand.vmem [shape: f32[1,32], index: 7, kind: input, shape index: {}]   ;;  %s3689_s8 = inlined_call_operand.vmem [shape: f32[1,32], index: 8, kind: input, shape index: {}]   ;;  %s3690_s9 = inlined_call_operand.hbm [shape: f32[2,16,32], index: 9, kind: output, shape index: {}]  }
   0x1   :  { %15 = vsyncpa [#allocation6], 0 }
   0x2   :  { %16 = vsyncpa [#allocation9], 0 }
   0x3   :  { %17 = vsyncpa [#allocation12], 0 }
   0x4   :  { %18 = vsyncpa [#allocation4], 0  ;;  %s3204_s30 = smov [#allocation5]   ;;  %s3205_s11 = smov [#allocation8]  }
   0x5   :  { %s36_s10 = sshll.u32 %s3204_s30, 4  ;;  %s60_s12 = sshll.u32 %s3205_s11, 4  ;;  %s37_s10 = int_to_ptr.vmem [resolvable:$true] %s36_s10  ;;  %s61_s12 = int_to_ptr.vmem [resolvable:$true] %s60_s12 }
   0x6   :  { %s3062_s13 = scalar_lea.vmem %s37_s10, 512  ;;  %p3067_p1 = scmp.lt.s32.totalorder %s37_s10, %s37_s10 }
   0x7   :  { %p3063_p0 = scmp.ne.s32.totalorder %s37_s10, %s3062_s13  ;;  %p3068_p2 = scmp.lt.s32.totalorder %s3062_s13, %s3062_s13 }
   0x9   :  { %p3069_p3 = por %p3068_p2, %p3067_p1 }
   0xb   :  { %p3070_p4 = pnand %p3069_p3, %p3063_p0 }
   0xd   :  { %3073 = shalt.err (!%p3070_p4)
}
   0xe   :  { %s3206_s14 = smov 128   ;;  %s3207_s15 = smov 8  }
   0xf   :  { %42 = dma.hbm_to_vmem [thread:$0]  %s3682_s1, 512, %s37_s10, [#allocation6], %s3206_s14, %s3206_s14, %s3207_s15  }
  0x10   :  { %s3082_s18 = scalar_lea.vmem %s61_s12, 512  ;;  %p3087_p6 = scmp.lt.s32.totalorder %s61_s12, %s61_s12 }
  0x11   :  { %p3083_p5 = scmp.ne.s32.totalorder %s61_s12, %s3082_s18  ;;  %p3088_p7 = scmp.lt.s32.totalorder %s3082_s18, %s3082_s18 }
  0x13   :  { %p3089_p8 = por %p3088_p7, %p3087_p6 }
  0x15   :  { %p3090_p9 = pnand %p3089_p8, %p3083_p5 }
  0x17   :  { %3093 = shalt.err (!%p3090_p9)
}
  0x18   :  { %66 = dma.hbm_to_vmem [thread:$0]  %s3684_s3, 512, %s61_s12, [#allocation9], %s3206_s14, %s3206_s14, %s3207_s15  }
  0x19   :  { %s3208_s21 = smov [#allocation2]   ;;  %s3209_s23 = smov [#allocation7]  }
  0x1a   :  { %s24_s22 = sshll.u32 %s3208_s21, 4  ;;  %s48_s24 = sshll.u32 %s3209_s23, 4  ;;  %s25_s22 = int_to_ptr.vmem [resolvable:$true] %s24_s22  ;;  %s49_s24 = int_to_ptr.vmem [resolvable:$true] %s48_s24 }
  0x1b   :  { %s3102_s1 = scalar_lea.vmem %s25_s22, 512  ;;  %p3107_p11 = scmp.lt.s32.totalorder %s25_s22, %s25_s22 }
  0x1c   :  { %p3103_p10 = scmp.ne.s32.totalorder %s25_s22, %s3102_s1  ;;  %p3108_p12 = scmp.lt.s32.totalorder %s3102_s1, %s3102_s1 }
  0x1e   :  { %p3109_p13 = por %p3108_p12, %p3107_p11 }
  0x20   :  { %p3110_p0 = pnand %p3109_p13, %p3103_p10 }
  0x22   :  { %3113 = shalt.err (!%p3110_p0)
}
  0x23   :  { %30 = dma.hbm_to_vmem [thread:$0]  %s3681_s0, 512, %s25_s22, [#allocation3], %s3206_s14, %s3206_s14, %s3207_s15  }
  0x24   :  { %s3122_s3 = scalar_lea.vmem %s49_s24, 512  ;;  %p3127_p2 = scmp.lt.s32.totalorder %s49_s24, %s49_s24 }
  0x25   :  { %p3123_p1 = scmp.ne.s32.totalorder %s49_s24, %s3122_s3  ;;  %p3128_p3 = scmp.lt.s32.totalorder %s3122_s3, %s3122_s3 }
  0x27   :  { %p3129_p4 = por %p3128_p3, %p3127_p2 }
  0x29   :  { %p3130_p5 = pnand %p3129_p4, %p3123_p1 }
  0x2b   :  { %3133 = shalt.err (!%p3130_p5)
}
  0x2c   :  { %54 = dma.hbm_to_vmem [thread:$0]  %s3683_s2, 512, %s49_s24, [#allocation6], %s3206_s14, %s3206_s14, %s3207_s15  }
  0x2d   :  { %s3210_s29 = smov [#allocation10]   ;;  %s3211_s10 = smov [#allocation11]  }
  0x2e   :  { %s72_s30 = sshll.u32 %s3210_s29, 4  ;;  %s84_s11 = sshll.u32 %s3211_s10, 4  ;;  %s73_s30 = int_to_ptr.vmem [resolvable:$true] %s72_s30  ;;  %s85_s11 = int_to_ptr.vmem [resolvable:$true] %s84_s11 }
  0x2f   :  { %s3142_s0 = scalar_lea.vmem %s73_s30, 512  ;;  %p3147_p7 = scmp.lt.s32.totalorder %s73_s30, %s73_s30 }
  0x30   :  { %p3143_p6 = scmp.ne.s32.totalorder %s73_s30, %s3142_s0  ;;  %p3148_p8 = scmp.lt.s32.totalorder %s3142_s0, %s3142_s0 }
  0x32   :  { %p3149_p9 = por %p3148_p8, %p3147_p7 }
  0x34   :  { %p3150_p10 = pnand %p3149_p9, %p3143_p6 }
  0x36   :  { %3153 = shalt.err (!%p3150_p10)
}
  0x37   :  { %78 = dma.hbm_to_vmem [thread:$0]  %s3685_s4, 512, %s73_s30, [#allocation9], %s3206_s14, %s3206_s14, %s3207_s15  }
  0x38   :  { %s3162_s2 = scalar_lea.vmem %s85_s11, 512  ;;  %p3167_p12 = scmp.lt.s32.totalorder %s85_s11, %s85_s11 }
  0x39   :  { %p3163_p11 = scmp.ne.s32.totalorder %s85_s11, %s3162_s2  ;;  %p3168_p13 = scmp.lt.s32.totalorder %s3162_s2, %s3162_s2 }
  0x3b   :  { %p3169_p0 = por %p3168_p13, %p3167_p12 }
  0x3d   :  { %p3170_p1 = pnand %p3169_p0, %p3163_p11 }
  0x3f   :  { %3173 = shalt.err (!%p3170_p1)
}
  0x40   :  { %90 = dma.hbm_to_vmem [thread:$0]  %s3686_s5, 512, %s85_s11, [#allocation12], %s3206_s14, %s3206_s14, %s3207_s15  }
  0x41   :  { %3194 = dma.done.wait [#allocation3], 512  }
  0x42   :  { %3195 = vsyncadd [#allocation3], 4294966784 }
  0x43   :  { %3196 = dma.done.wait [#allocation6], 1024  }
  0x44   :  { %3197 = vsyncadd [#allocation6], 4294966272 }
  0x45   :  { %3198 = dma.done.wait [#allocation9], 1024  }
  0x46   :  { %3199 = vsyncadd [#allocation9], 4294966272 }
  0x47   :  { %3200 = dma.done.wait [#allocation12], 512  }
  0x48   :  { %3201 = vsyncadd [#allocation12], 4294966784  ;;  %v115_v0 = vld [vmem:[#allocation2] sm:$0xff]  ;;  %v117_v1 = vld [vmem:[#allocation2 + $0x10] sm:$0xff]  ;;  %s3212_s4 = smov 112   ;;  %vm121_vm0 = vcmask 130048  }
  0x49   :  { %222 = vrot.lane.b32.xlu0 %v115_v0, %s3212_s4  ;;  %226 = vrot.lane.b32.xlu1 %v117_v1, %s3212_s4  ;;  %v116_v2 = vld [vmem:[#allocation2 + $0x8] sm:$0xff]  ;;  %v118_v3 = vld [vmem:[#allocation2 + $0x18] sm:$0xff]  ;;  %v220_v5 = vld [vmem:[#allocation8 + $0x10] sm:$0xff]  ;;  %s3213_s5 = smov 16   ;;  %vm830_vm1 = vcmask 64512   ;;  %s3216_s23 = smov 24  }
  0x4a   :  { %v221_v4 = vld [vmem:[#allocation8 + $0x18] sm:$0xff]  ;;  %2776 = vmatprep.mubr.msk.f32.mxu0 %vm121_vm0, %v115_v0  ;;  %v120_v6 = vld [vmem:[#allocation8 + $0x8] sm:$0xff]  ;;  %v119_v8 = vld [vmem:[#allocation8] sm:$0xff]  ;;  %vm2567_vm2 = vcmask 195584   ;;  %vm2572_vm3 = vcmask 261120   ;;  %s3217_s24 = smov [#allocation13]  }
  0x4b   :  { %2782 = vmatprep.subr.mxu1 %v221_v4  ;;  %v459_v7 = vld [vmem:[#allocation10 + $0x18] sm:$0xff]  ;;  %v354_v9 = vld [vmem:[#allocation5] sm:$0xff]  ;;  %v355_v10 = vld [vmem:[#allocation5 + $0x8] sm:$0xff]  ;;  %2772 = vmatprep.subr.mxu0 %v120_v6  ;;  %s2582_s1 = sshll.u32 %s3217_s24, 4  ;;  %s2583_s1 = int_to_ptr.vmem [resolvable:$true] %s2582_s1 }
  0x4c   :  { %2783 = vmatpush3.msra.mxu1 %v221_v4  ;;  %2773 = vmatpush3.msra.mxu0 %v120_v6  ;;  %v359_v11 = vld [vmem:[#allocation10 + $0x8] sm:$0xff]  ;;  %v356_v12 = vld [vmem:[#allocation5 + $0x10] sm:$0xff]  ;;  %v357_v13 = vld [vmem:[#allocation5 + $0x18] sm:$0xff]  ;;  %s3174_s25 = scalar_lea.vmem %s2583_s1, 512  ;;  %p3179_p3 = scmp.lt.s32.totalorder %s2583_s1, %s2583_s1 }
  0x4d   :  { %224 = vrot.lane.b32.xlu0 %v116_v2, %s3212_s4  ;;  %228 = vrot.lane.b32.xlu1 %v118_v3, %s3212_s4  ;;  %v358_v14 = vld [vmem:[#allocation10] sm:$0xff]  ;;  %v593_v15 = vld [vmem:[#allocation7 + $0x8] sm:$0xff]  ;;  %v595_v17 = vld [vmem:[#allocation7 + $0x18] sm:$0xff]  ;;  %p3175_p2 = scmp.ne.s32.totalorder %s2583_s1, %s3174_s25  ;;  %p3180_p4 = scmp.lt.s32.totalorder %s3174_s25, %s3174_s25 }
  0x4e   :  { %2784 = vmatprep.subr.mxu1 %v220_v5  ;;  %2774 = vmatprep.subr.mxu0 %v119_v8  ;;  %v592_v16 = vld [vmem:[#allocation7] sm:$0xff]  ;;  %v458_v22 = vld [vmem:[#allocation10 + $0x10] sm:$0xff]  ;;  %v597_v28 = vld [vmem:[#allocation11 + $0x8] sm:$0xff] }
  0x4f   :  { %2785 = vmatpush3.msra.mxu1 %v220_v5  ;;  %2775 = vmatpush3.msra.mxu0 %v119_v8  ;;  %v594_v27 = vld [vmem:[#allocation7 + $0x10] sm:$0xff]  ;;  %v697_v29 = vld [vmem:[#allocation11 + $0x18] sm:$0xff]  ;;  %v596_v31 = vld [vmem:[#allocation11] sm:$0xff]  ;;  %p3181_p5 = por %p3180_p4, %p3179_p3 }
  0x50   :  { %2802 = vmatprep.subr.mxu1 %v459_v7  ;;  %2777 = vmatmul.mubr.msk.f32.vlgmr.msra.gmra.mxu0 %vm121_vm0, %v116_v2  ;;  %v696_v32 = vld [vmem:[#allocation11 + $0x10] sm:$0xff]  ;;  %v2605_v48 = vld [vmem:[%s3687_s6] ss:$0 sm:$0xff]  ;;  %s3214_s6 = smov 120  }
  0x51   :  { %460 = vrot.lane.b32.xlu0 %v354_v9, %s3212_s4  ;;  %462 = vrot.lane.b32.xlu1 %v355_v10, %s3212_s4  ;;  %v2614_v57 = vld [vmem:[%s3688_s7] ss:$0 sm:$0xff]  ;;  %p3182_p6 = pnand %p3181_p5, %p3175_p2 }
  0x52   :  { %2792 = vmatprep.subr.mxu0 %v359_v11  ;;  %2779 = vmatprep.mubr.msk.f32.mxu0 %vm121_vm0, %v117_v1 }
  0x53   :  { %2793 = vmatpush3.msra.mxu0 %v359_v11 }
  0x54   :  { %2794 = vmatprep.subr.mxu0 %v358_v14  ;;  %2780 = vmatmul.mubr.msk.f32.gmra.mxu0 %vm121_vm0, %v118_v3 }
  0x55   :  { %464 = vrot.lane.b32.xlu0 %v356_v12, %s3212_s4  ;;  %466 = vrot.lane.b32.xlu1 %v357_v13, %s3212_s4 }
  0x56   :  { %2795 = vmatpush3.msra.mxu0 %v358_v14  ;;  %2796 = vmatprep.mubr.msk.f32.mxu0 %vm121_vm0, %v354_v9 }
  0x57   :  { %2812 = vmatprep.subr.mxu0 %v597_v28 }
  0x58   :  { %2797 = vmatmul.mubr.msk.f32.vlgmr.msra.gmra.mxu0 %vm121_vm0, %v355_v10 }
  0x59   :  { %700 = vrot.lane.b32.xlu1 %v593_v15, %s3212_s4  ;;  %698 = vrot.lane.b32.xlu0 %v592_v16, %s3212_s4 }
  0x5a   :  { %2799 = vmatprep.mubr.msk.f32.mxu0 %vm121_vm0, %v356_v12  ;;  %2813 = vmatpush3.msra.mxu0 %v597_v28 }
  0x5b   :  { %2814 = vmatprep.subr.mxu0 %v596_v31 }
  0x5c   :  { %2800 = vmatmul.mubr.msk.f32.gmra.mxu0 %vm121_vm0, %v357_v13 }
  0x5d   :  { %704 = vrot.lane.b32.xlu1 %v595_v17, %s3212_s4  ;;  %2816 = vmatprep.mubr.msk.f32.mxu0 %vm121_vm0, %v592_v16 }
  0x5e   :  { %702 = vrot.lane.b32.xlu0 %v594_v27, %s3212_s4  ;;  %2815 = vmatpush3.msra.mxu0 %v596_v31 }
  0x60   :  { %2817 = vmatmul.mubr.msk.f32.vlgmr.msra.gmra.mxu0 %vm121_vm0, %v593_v15 }
  0x61   :  { %2819 = vmatprep.mubr.msk.f32.mxu0 %vm121_vm0, %v594_v27 }
  0x64   :  { %2820 = vmatmul.mubr.msk.f32.gmra.mxu0 %vm121_vm0, %v595_v17 }
  0xbb   :  { %v223_v18 = vpop.permute.xlu0 %222  ;;  %v227_v19 = vpop.permute.xlu1 %226 }
  0xbc   :  { %2786 = vmatprep.mubr.msk.f32.mxu1 %vm121_vm0, %v223_v18 }
  0xbf   :  { %v225_v20 = vpop.permute.xlu0 %224  ;;  %v229_v21 = vpop.permute.xlu1 %228 }
  0xc0   :  { %2787 = vmatmul.mubr.msk.f32.vlgmr.msra.gmra.mxu1 %vm121_vm0, %v225_v20 }
  0xc1   :  { %2789 = vmatprep.mubr.msk.f32.mxu1 %vm121_vm0, %v227_v19  ;;  %2803 = vmatpush3.msra.mxu1 %v459_v7 }
  0xc2   :  { %2804 = vmatprep.subr.mxu1 %v458_v22 }
  0xc3   :  { %v461_v23 = vpop.permute.xlu0 %460  ;;  %v463_v24 = vpop.permute.xlu1 %462  ;;  %2805 = vmatpush3.msra.mxu1 %v458_v22 }
  0xc4   :  { %2790 = vmatmul.mubr.msk.f32.gmra.mxu1 %vm121_vm0, %v229_v21  ;;  %2822 = vmatprep.subr.mxu1 %v697_v29 }
  0xc5   :  { %2806 = vmatprep.mubr.msk.f32.mxu1 %vm121_vm0, %v461_v23 }
  0xc7   :  { %v465_v25 = vpop.permute.xlu0 %464  ;;  %v467_v26 = vpop.permute.xlu1 %466 }
  0xc8   :  { %2807 = vmatmul.mubr.msk.f32.vlgmr.msra.gmra.mxu1 %vm121_vm0, %v463_v24 }
  0xc9   :  { %2809 = vmatprep.mubr.msk.f32.mxu1 %vm121_vm0, %v465_v25  ;;  %2823 = vmatpush3.msra.mxu1 %v697_v29 }
  0xca   :  { %2824 = vmatprep.subr.mxu1 %v696_v32 }
  0xcb   :  { %v699_v30 = vpop.permute.xlu0 %698  ;;  %v701_v33 = vpop.permute.xlu1 %700  ;;  %2825 = vmatpush3.msra.mxu1 %v696_v32 }
  0xcc   :  { %2810 = vmatmul.mubr.msk.f32.gmra.mxu1 %vm121_vm0, %v467_v26 }
  0xcd   :  { %2826 = vmatprep.mubr.msk.f32.mxu1 %vm121_vm0, %v699_v30 }
  0xcf   :  { %v705_v35 = vpop.permute.xlu1 %704 }
  0xd0   :  { %2827 = vmatmul.mubr.msk.f32.vlgmr.msra.gmra.mxu1 %vm121_vm0, %v701_v33  ;;  %v703_v34 = vpop.permute.xlu0 %702 }
  0xd1   :  { %2829 = vmatprep.mubr.msk.f32.mxu1 %vm121_vm0, %v703_v34 }
  0xd4   :  { %2830 = vmatmul.mubr.msk.f32.gmra.mxu1 %vm121_vm0, %v705_v35 }
 0x110   :  { %v2778_v44 = vpop.f32.mrf.mxu0 }
 0x112   :  { %v200_v45 = vpop.f32.mrf.mxu0 }
 0x114   :  { %v2781_v46 = vpop.f32.mrf.mxu0 }
 0x116   :  { %v210_v47 = vpop.f32.mrf.mxu0 }
 0x118   :  { %v2798_v50 = vpop.f32.mrf.mxu0 }
 0x11a   :  { %v438_v54 = vpop.f32.mrf.mxu0 }
 0x11c   :  { %v2801_v59 = vpop.f32.mrf.mxu0 }
 0x11e   :  { %v448_v2 = vpop.f32.mrf.mxu0 }
 0x120   :  { %v2818_v14 = vpop.f32.mrf.mxu0 }
 0x122   :  { %v676_v16 = vpop.f32.mrf.mxu0 }
 0x124   :  { %v2821_v18 = vpop.f32.mrf.mxu0 }
 0x126   :  { %v686_v20 = vpop.f32.mrf.mxu0 }
 0x180   :  { %v2788_v36 = vpop.f32.mrf.mxu1 }
 0x182   :  { %v304_v37 = vpop.f32.mrf.mxu1 }
 0x183   :  { %327 = vrot.lane.b32.xlu1 %v304_v37, %s3213_s5 }
 0x184   :  { %v2791_v38 = vpop.f32.mrf.mxu1 }
 0x186   :  { %v314_v39 = vpop.f32.mrf.mxu1 }
 0x187   :  { %331 = vrot.lane.b32.xlu0 %v314_v39, %s3213_s5  ;;  %v2623_v39 = vld [vmem:[%s3689_s8] ss:$0 sm:$0xff]  ;;  %s3215_s8 = smov 104  }
 0x188   :  { %v2808_v40 = vpop.f32.mrf.mxu1 }
 0x18a   :  { %v542_v41 = vpop.f32.mrf.mxu1 }
 0x18b   :  { %567 = vrot.lane.b32.xlu0 %v2808_v40, %s3213_s5 }
 0x18c   :  { %v2811_v42 = vpop.f32.mrf.mxu1 }
 0x18d   :  { %571 = vrot.lane.b32.xlu1 %v2811_v42, %s3213_s5 }
 0x18e   :  { %v552_v43 = vpop.f32.mrf.mxu1 }
 0x18f   :  { %565 = vrot.lane.b32.xlu0 %v542_v41, %s3213_s5 }
 0x190   :  { %v2828_v15 = vpop.f32.mrf.mxu1 }
 0x191   :  { %569 = vrot.lane.b32.xlu1 %v552_v43, %s3213_s5 }
 0x192   :  { %v780_v17 = vpop.f32.mrf.mxu1 }
 0x193   :  { %329 = vrot.lane.b32.xlu0 %v2788_v36, %s3213_s5 }
 0x194   :  { %v2831_v19 = vpop.f32.mrf.mxu1 }
 0x195   :  { %333 = vrot.lane.b32.xlu1 %v2791_v38, %s3213_s5 }
 0x196   :  { %v790_v21 = vpop.f32.mrf.mxu1 }
 0x1f5   :  { %v328_v49 = vpop.permute.xlu1 %327 }
 0x1f6   :  { %v339_v51 = vsel %vm121_vm0, %v200_v45, %v328_v49 }
 0x1f7   :  { %v3352_v52 = vadd.f32 %v2605_v48, %v339_v51 }
 0x1f9   :  { %v332_v53 = vpop.permute.xlu0 %331  ;;  %2836 = vmatprep.mubr.msk.f32.mxu0 %vm830_vm1, %v3352_v52 }
 0x1fa   :  { %v341_v55 = vsel %vm121_vm0, %v210_v47, %v332_v53 }
 0x1fb   :  { %v3357_v56 = vadd.f32 %v2605_v48, %v341_v55 }
 0x1fd   :  { %v568_v58 = vpop.permute.xlu0 %567  ;;  %2843 = vmatprep.mubr.msk.f32.mxu1 %vm830_vm1, %v3357_v56 }
 0x1fe   :  { %v578_v60 = vsel %vm121_vm0, %v2798_v50, %v568_v58 }
 0x1ff   :  { %v3365_v61 = vadd.f32 %v2614_v57, %v578_v60  ;;  %v572_v62 = vpop.permute.xlu1 %571 }
 0x200   :  { %v580_v63 = vsel %vm121_vm0, %v2801_v59, %v572_v62 }
 0x201   :  { %v3368_v0 = vadd.f32 %v2614_v57, %v580_v63  ;;  %v566_v1 = vpop.permute.xlu0 %565  ;;  %2832 = vmatprep.subr.msk.mxu0 %vm830_vm1, %v3365_v61 }
 0x202   :  { %v577_v3 = vsel %vm121_vm0, %v438_v54, %v566_v1  ;;  %2833 = vmatpush3.xpose.msk.msra.mxu0 %vm830_vm1, %v3365_v61 }
 0x203   :  { %v3375_v4 = vadd.f32 %v2614_v57, %v577_v3  ;;  %v570_v5 = vpop.permute.xlu1 %569  ;;  %2839 = vmatprep.subr.msk.mxu1 %vm830_vm1, %v3368_v0 }
 0x204   :  { %v579_v6 = vsel %vm121_vm0, %v448_v2, %v570_v5  ;;  %2840 = vmatpush3.xpose.msk.msra.mxu1 %vm830_vm1, %v3368_v0 }
 0x205   :  { %v3382_v7 = vadd.f32 %v2614_v57, %v579_v6  ;;  %v330_v8 = vpop.permute.xlu0 %329  ;;  %2834 = vmatprep.subr.msk.mxu0 %vm830_vm1, %v3375_v4 }
 0x206   :  { %v340_v9 = vsel %vm121_vm0, %v2778_v44, %v330_v8  ;;  %2835 = vmatpush3.xpose.msk.msra.mxu0 %vm830_vm1, %v3375_v4 }
 0x207   :  { %v3389_v10 = vadd.f32 %v2605_v48, %v340_v9  ;;  %v334_v11 = vpop.permute.xlu1 %333  ;;  %2841 = vmatprep.subr.msk.mxu1 %vm830_vm1, %v3382_v7 }
 0x208   :  { %v342_v12 = vsel %vm121_vm0, %v2781_v46, %v334_v11  ;;  %2842 = vmatpush3.xpose.msk.msra.mxu1 %vm830_vm1, %v3382_v7 }
 0x209   :  { %v3396_v13 = vadd.f32 %v2605_v48, %v342_v12  ;;  %2837 = vmatmul.mubr.msk.f32.vlgmr.msra.gmra.mxu0 %vm830_vm1, %v3389_v10 }
 0x20b   :  { %2844 = vmatmul.mubr.msk.f32.vlgmr.msra.gmra.mxu1 %vm830_vm1, %v3396_v13 }
 0x2c9   :  { %v2838_v22 = vpop.f32.mrf.mxu0 }
 0x2ca   :  { %v1006_v27 = vmul.f32 0.35355338, %v2838_v22 }
 0x2cb   :  { %v909_v23 = vpop.f32.mrf.mxu0  ;;  %v2845_v24 = vpop.f32.mrf.mxu1 }
 0x2cc   :  { %v1005_v25 = vmul.f32 0.35355338, %v909_v23  ;;  %v1008_v31 = vmul.f32 0.35355338, %v2845_v24  ;;  %v1012_v32 = vsel %vm121_vm0, %v1006_v27, -inf }
 0x2cd   :  { %v996_v26 = vpop.f32.mrf.mxu1 }
 0x2ce   :  { %v1007_v28 = vmul.f32 0.35355338, %v996_v26  ;;  %v1009_v29 = vsel %vm121_vm0, %v1005_v25, -inf  ;;  %v1018_v33 = vsel %vm121_vm0, %v1008_v31, -inf }
 0x2cf   :  { %1010 = vmax.xlane.f32.xlu0 %v1009_v29 }
 0x2d0   :  { %v1015_v30 = vsel %vm121_vm0, %v1007_v28, -inf }
 0x2d1   :  { %1016 = vmax.xlane.f32.xlu1 %v1015_v30 }
 0x2d3   :  { %1013 = vmax.xlane.f32.xlu0 %v1012_v32 }
 0x2d7   :  { %1019 = vmax.xlane.f32.xlu0 %v1018_v33 }
 0x2e2   :  { %805 = vrot.lane.b32.xlu1 %v2828_v15, %s3213_s5 }
 0x2e6   :  { %803 = vrot.lane.b32.xlu1 %v780_v17, %s3213_s5 }
 0x2ea   :  { %807 = vrot.lane.b32.xlu1 %v790_v21, %s3213_s5 }
 0x2ed   :  { %809 = vrot.lane.b32.xlu0 %v2831_v19, %s3213_s5 }
 0x2ee   :  { %1332 = vrot.lane.b32.xlu1 %v3368_v0, %s3214_s6 }
 0x2f1   :  { %1241 = vrot.lane.b32.xlu0 %v3365_v61, %s3214_s6 }
 0x358   :  { %v3414_v34 = vpop.xlane.xlu0 %1010 }
 0x359   :  { %v1021_v35 = vmax.f32 %v3414_v34, 0.0 }
 0x35a   :  { %v3417_v36 = vpop.xlane.xlu1 %1016 }
 0x35b   :  { %v1023_v38 = vmax.f32 %v3417_v36, 0.0  ;;  %v1025_v40 = vsub.f32 %v1005_v25, %v1021_v35 }
 0x35c   :  { %v1014_v37 = vpop.xlane.xlu0 %1013 }
 0x35d   :  { %v1022_v41 = vmax.f32 %v1014_v37, 0.0  ;;  %v1027_v47 = vsub.f32 %v1007_v28, %v1023_v38  ;;  %v1029_v49 = vmul.f32 1.442695, %v1025_v40  ;;  %v1051_v22 = vsub.f32 0.0, %v1023_v38 }
 0x35e   :  { %v806_v42 = vpop.permute.xlu1 %805 }
 0x35f   :  { %v816_v43 = vsel %vm121_vm0, %v2818_v14, %v806_v42  ;;  %v1026_v44 = vsub.f32 %v1006_v27, %v1022_v41  ;;  %v1033_v58 = vmul.f32 1.442695, %v1027_v47  ;;  %v1050_v17 = vsub.f32 0.0, %v1022_v41 }
 0x360   :  { %v3424_v45 = vadd.f32 %v2623_v39, %v816_v43  ;;  %v1020_v46 = vpop.xlane.xlu0 %1019  ;;  %v1057_v24 = vmul.f32 1.442695, %v1051_v22 }
 0x361   :  { %v1024_v48 = vmax.f32 %v1020_v46, 0.0  ;;  %v1031_v50 = vmul.f32 1.442695, %v1026_v44 }
 0x362   :  { %2846 = vmatprep.subr.mxu0 %v3424_v45  ;;  %v804_v51 = vpop.permute.xlu1 %803 }
 0x363   :  { %v1028_v53 = vsub.f32 %v1008_v31, %v1024_v48  ;;  %v815_v54 = vsel %vm121_vm0, %v676_v16, %v804_v51  ;;  %2847 = vmatpush3.msra.mxu0 %v3424_v45  ;;  %2958 = vpow2.f32 %v1031_v50  ;;  %v1052_v19 = vsub.f32 0.0, %v1024_v48 }
 0x364   :  { %v3431_v55 = vadd.f32 %v2623_v39, %v815_v54  ;;  %v810_v57 = vpop.permute.xlu0 %809  ;;  %2960 = vpow2.f32 %v1029_v49 }
 0x365   :  { %v1035_v59 = vmul.f32 1.442695, %v1028_v53  ;;  %v818_v60 = vsel %vm121_vm0, %v2821_v18, %v810_v57  ;;  %v1049_v18 = vsub.f32 0.0, %v1021_v35  ;;  %v1059_v23 = vmul.f32 1.442695, %v1052_v19 }
 0x366   :  { %v3434_v62 = vadd.f32 %v2623_v39, %v818_v60  ;;  %2848 = vmatprep.subr.mxu0 %v3431_v55  ;;  %v808_v63 = vpop.permute.xlu1 %807 }
 0x367   :  { %2962 = vpow2.f32 %v1035_v59  ;;  %v817_v1 = vsel %vm121_vm0, %v686_v20, %v808_v63  ;;  %2849 = vmatpush3.msra.mxu0 %v3431_v55  ;;  %v1055_v20 = vmul.f32 1.442695, %v1050_v17  ;;  %v1053_v21 = vmul.f32 1.442695, %v1049_v18 }
 0x368   :  { %v3439_v2 = vadd.f32 %v2623_v39, %v817_v1  ;;  %2853 = vmatprep.subr.mxu1 %v3434_v62  ;;  %v3442_v3 = vpop.permute.xlu0 %1241  ;;  %2964 = vpow2.f32 %v1033_v58 }
 0x369   :  { %2854 = vmatpush3.msra.mxu1 %v3434_v62  ;;  %2860 = vmatprep.subr.msk.mxu0 %vm830_vm1, %v3442_v3  ;;  %2966 = vpow2.f32 %v1055_v20 }
 0x36a   :  { %2855 = vmatprep.subr.mxu1 %v3439_v2  ;;  %v3448_v5 = vpop.permute.xlu1 %1332  ;;  %2968 = vpow2.f32 %v1053_v21 }
 0x36b   :  { %2856 = vmatpush3.msra.mxu1 %v3439_v2  ;;  %2970 = vpow2.f32 %v1059_v23 }
 0x36c   :  { %2867 = vmatprep.subr.msk.mxu1 %vm830_vm1, %v3448_v5  ;;  %2972 = vpow2.f32 %v1057_v24 }
 0x370   :  { %v2959_v6 = vpop.eup %2958 }
 0x371   :  { %v1040_v8 = vsel %vm121_vm0, %v2959_v6, 0.0  ;;  %v2961_v9 = vpop.eup %2960 }
 0x372   :  { %1041 = vadd.xlane.f32.xlu1 %v1040_v8  ;;  %v1037_v15 = vsel %vm121_vm0, %v2961_v9, 0.0 }
 0x374   :  { %v2963_v11 = vpop.eup %2962 }
 0x375   :  { %v1046_v12 = vsel %vm121_vm0, %v2963_v11, 0.0  ;;  %v2965_v14 = vpop.eup %2964 }
 0x376   :  { %1047 = vadd.xlane.f32.xlu0 %v1046_v12  ;;  %1038 = vadd.xlane.f32.xlu1 %v1037_v15  ;;  %v1043_v16 = vsel %vm121_vm0, %v2965_v14, 0.0  ;;  %v2967_v26 = vpop.eup %2966 }
 0x377   :  { %v2969_v28 = vpop.eup %2968 }
 0x378   :  { %v2971_v30 = vpop.eup %2970 }
 0x379   :  { %v2973_v34 = vpop.eup %2972 }
 0x37a   :  { %1044 = vadd.xlane.f32.xlu0 %v1043_v16 }
 0x387   :  { %1330 = vrot.lane.b32.xlu1 %v3382_v7, %s3214_s6 }
 0x38b   :  { %1326 = vrot.lane.b32.xlu1 %v3357_v56, %s3214_s6 }
 0x38f   :  { %1328 = vrot.lane.b32.xlu1 %v3396_v13, %s3214_s6 }
 0x390   :  { %1239 = vrot.lane.b32.xlu0 %v3375_v4, %s3214_s6 }
 0x394   :  { %1235 = vrot.lane.b32.xlu0 %v3352_v52, %s3214_s6 }
 0x398   :  { %1237 = vrot.lane.b32.xlu0 %v3389_v10, %s3214_s6 }
 0x3fb   :  { %v1042_v25 = vpop.xlane.xlu1 %1041 }
 0x3fc   :  { %v1062_v27 = vadd.f32 %v2967_v26, %v1042_v25 }
 0x3fe   :  { %2974 = vrcp.f32 %v1062_v27 }
 0x3ff   :  { %v1048_v29 = vpop.xlane.xlu0 %1047  ;;  %v1039_v31 = vpop.xlane.xlu1 %1038 }
 0x400   :  { %v1064_v32 = vadd.f32 %v2971_v30, %v1048_v29  ;;  %v1061_v33 = vadd.f32 %v2969_v28, %v1039_v31 }
 0x402   :  { %2976 = vrcp.f32 %v1061_v33 }
 0x403   :  { %v1045_v35 = vpop.xlane.xlu0 %1044  ;;  %2978 = vrcp.f32 %v1064_v32  ;;  %v1331_v40 = vpop.permute.xlu1 %1330 }
 0x404   :  { %v1063_v36 = vadd.f32 %v2973_v34, %v1045_v35 }
 0x406   :  { %2980 = vrcp.f32 %v1063_v36 }
 0x407   :  { %v1240_v37 = vpop.permute.xlu0 %1239  ;;  %v1327_v49 = vpop.permute.xlu1 %1326 }
 0x40b   :  { %v2975_v38 = vpop.eup %2974  ;;  %v1236_v46 = vpop.permute.xlu0 %1235 }
 0x40c   :  { %v1070_v43 = vmul.f32 %v2975_v38, %v2959_v6  ;;  %v1329_v51 = vpop.permute.xlu1 %1328 }
 0x40f   :  { %v2977_v39 = vpop.eup %2976  ;;  %v1238_v50 = vpop.permute.xlu0 %1237 }
 0x410   :  { %v1069_v41 = vmul.f32 %v2977_v39, %v2961_v9  ;;  %v2979_v42 = vpop.eup %2978 }
 0x411   :  { %v1072_v48 = vmul.f32 %v2979_v42, %v2963_v11 }
 0x412   :  { %2850 = vmatprep.mubr.msk.f32.mxu0 %vm121_vm0, %v1069_v41 }
 0x413   :  { %v2981_v44 = vpop.eup %2980  ;;  %2851 = vmatmul.mubr.msk.f32.vlgmr.msra.gmra.mxu0 %vm121_vm0, %v1070_v43 }
 0x414   :  { %v1071_v47 = vmul.f32 %v2981_v44, %v2965_v14  ;;  %2861 = vmatpush3.xpose.msk.msra.mxu0 %vm830_vm1, %v3442_v3  ;;  %2864 = vmatprep.mubr.msk.f32.mxu0 %vm830_vm1, %v1236_v46 }
 0x415   :  { %2862 = vmatprep.subr.msk.mxu0 %vm830_vm1, %v1240_v37 }
 0x416   :  { %2857 = vmatprep.mubr.msk.f32.mxu1 %vm121_vm0, %v1071_v47 }
 0x417   :  { %2858 = vmatmul.mubr.msk.f32.vlgmr.msra.gmra.mxu1 %vm121_vm0, %v1072_v48 }
 0x418   :  { %2868 = vmatpush3.xpose.msk.msra.mxu1 %vm830_vm1, %v3448_v5  ;;  %2871 = vmatprep.mubr.msk.f32.mxu1 %vm830_vm1, %v1327_v49 }
 0x419   :  { %2863 = vmatpush3.xpose.msk.msra.mxu0 %vm830_vm1, %v1240_v37  ;;  %2869 = vmatprep.subr.msk.mxu1 %vm830_vm1, %v1331_v40 }
 0x41c   :  { %2865 = vmatmul.mubr.msk.f32.vlgmr.msra.gmra.mxu0 %vm830_vm1, %v1238_v50  ;;  %2870 = vmatpush3.xpose.msk.msra.mxu1 %vm830_vm1, %v1331_v40 }
 0x41f   :  { %2872 = vmatmul.mubr.msk.f32.vlgmr.msra.gmra.mxu1 %vm830_vm1, %v1329_v51 }
 0x4d3   :  { %v3487_v53 = vpop.f32.mrf.mxu0 }
 0x4d5   :  { %v3491_v57 = vpop.f32.mrf.mxu0 }
 0x4d7   :  { %v3489_v54 = vpop.f32.mrf.mxu1 }
 0x4d9   :  { %v3493_v59 = vpop.f32.mrf.mxu1 }
 0x4dc   :  { %v2866_v58 = vpop.f32.mrf.mxu0 }
 0x4dd   :  { %v1418_v3 = vmul.f32 0.35355338, %v2866_v58 }
 0x4de   :  { %v1317_v60 = vpop.f32.mrf.mxu0 }
 0x4df   :  { %v1417_v63 = vmul.f32 0.35355338, %v1317_v60  ;;  %v2873_v1 = vpop.f32.mrf.mxu1  ;;  %v1424_v12 = vsel %vm121_vm0, %v1418_v3, -inf }
 0x4e0   :  { %v1420_v11 = vmul.f32 0.35355338, %v2873_v1 }
 0x4e1   :  { %v1421_v5 = vsel %vm121_vm0, %v1417_v63, -inf  ;;  %v1408_v6 = vpop.f32.mrf.mxu1 }
 0x4e2   :  { %1422 = vmax.xlane.f32.xlu0 %v1421_v5  ;;  %v1419_v8 = vmul.f32 0.35355338, %v1408_v6  ;;  %v1430_v14 = vsel %vm121_vm0, %v1420_v11, -inf }
 0x4e4   :  { %v1427_v9 = vsel %vm121_vm0, %v1419_v8, -inf }
 0x4e5   :  { %1428 = vmax.xlane.f32.xlu1 %v1427_v9 }
 0x4e6   :  { %1425 = vmax.xlane.f32.xlu0 %v1424_v12 }
 0x4ea   :  { %1431 = vmax.xlane.f32.xlu0 %v1430_v14 }
 0x4f6   :  { %1489 = vrot.lane.b32.xlu1 %v3424_v45, %s3214_s6 }
 0x4fa   :  { %1487 = vrot.lane.b32.xlu1 %v3431_v55, %s3214_s6 }
 0x4fe   :  { %1576 = vrot.lane.b32.xlu1 %v3439_v2, %s3214_s6 }
 0x500   :  { %1578 = vrot.lane.b32.xlu0 %v3434_v62, %s3214_s6 }
 0x502   :  { %1760 = vrot.lane.b32.xlu1 %v3368_v0, %s3212_s4 }
 0x504   :  { %1669 = vrot.lane.b32.xlu0 %v3365_v61, %s3212_s4 }
 0x56b   :  { %v1423_v15 = vpop.xlane.xlu0 %1422 }
 0x56c   :  { %v1433_v16 = vmax.f32 %v1423_v15, 0.0 }
 0x56e   :  { %v1429_v17 = vpop.xlane.xlu1 %1428  ;;  %v1437_v19 = vsub.f32 %v1417_v63, %v1433_v16  ;;  %v1461_v47 = vsub.f32 0.0, %v1433_v16 }
 0x56f   :  { %v1426_v18 = vpop.xlane.xlu0 %1425  ;;  %v1435_v21 = vmax.f32 %v1429_v17, 0.0 }
 0x570   :  { %v1434_v20 = vmax.f32 %v1426_v18, 0.0  ;;  %v1441_v25 = vmul.f32 1.442695, %v1437_v19  ;;  %v1465_v50 = vmul.f32 1.442695, %v1461_v47 }
 0x571   :  { %v1439_v27 = vsub.f32 %v1419_v8, %v1435_v21  ;;  %v1463_v51 = vsub.f32 0.0, %v1435_v21 }
 0x572   :  { %v1438_v22 = vsub.f32 %v1418_v3, %v1434_v20  ;;  %v1490_v23 = vpop.permute.xlu1 %1489  ;;  %v1462_v46 = vsub.f32 0.0, %v1434_v20 }
 0x573   :  { %v1432_v24 = vpop.xlane.xlu0 %1431  ;;  %2874 = vmatprep.subr.mxu0 %v1490_v23  ;;  %v1445_v32 = vmul.f32 1.442695, %v1439_v27  ;;  %v1469_v60 = vmul.f32 1.442695, %v1463_v51 }
 0x574   :  { %v1443_v26 = vmul.f32 1.442695, %v1438_v22  ;;  %v1436_v28 = vmax.f32 %v1432_v24, 0.0  ;;  %2875 = vmatpush3.msra.mxu0 %v1490_v23  ;;  %v1467_v49 = vmul.f32 1.442695, %v1462_v46 }
 0x576   :  { %2982 = vpow2.f32 %v1443_v26  ;;  %v1440_v29 = vsub.f32 %v1420_v11, %v1436_v28  ;;  %v1488_v30 = vpop.permute.xlu1 %1487  ;;  %v1464_v48 = vsub.f32 0.0, %v1436_v28 }
 0x577   :  { %v1579_v31 = vpop.permute.xlu0 %1578  ;;  %2876 = vmatprep.subr.mxu0 %v1488_v30  ;;  %2984 = vpow2.f32 %v1441_v25 }
 0x578   :  { %v1447_v33 = vmul.f32 1.442695, %v1440_v29  ;;  %2881 = vmatprep.subr.mxu1 %v1579_v31  ;;  %2877 = vmatpush3.msra.mxu0 %v1488_v30  ;;  %v1471_v58 = vmul.f32 1.442695, %v1464_v48 }
 0x579   :  { %2882 = vmatpush3.msra.mxu1 %v1579_v31 }
 0x57a   :  { %2986 = vpow2.f32 %v1447_v33  ;;  %v1577_v34 = vpop.permute.xlu1 %1576 }
 0x57b   :  { %v3511_v35 = vpop.permute.xlu0 %1669  ;;  %2883 = vmatprep.subr.mxu1 %v1577_v34  ;;  %2988 = vpow2.f32 %v1445_v32 }
 0x57c   :  { %2888 = vmatprep.subr.msk.mxu0 %vm830_vm1, %v3511_v35  ;;  %2884 = vmatpush3.msra.mxu1 %v1577_v34  ;;  %2990 = vpow2.f32 %v1467_v49 }
 0x57d   :  { %2992 = vpow2.f32 %v1465_v50 }
 0x57e   :  { %v3515_v36 = vpop.permute.xlu1 %1760  ;;  %2994 = vpow2.f32 %v1471_v58 }
 0x57f   :  { %2895 = vmatprep.subr.msk.mxu1 %vm830_vm1, %v3515_v36  ;;  %2996 = vpow2.f32 %v1469_v60 }
 0x583   :  { %v2983_v37 = vpop.eup %2982 }
 0x584   :  { %v1452_v38 = vsel %vm121_vm0, %v2983_v37, 0.0  ;;  %v2985_v39 = vpop.eup %2984 }
 0x585   :  { %1453 = vadd.xlane.f32.xlu1 %v1452_v38  ;;  %v1449_v42 = vsel %vm121_vm0, %v2985_v39, 0.0 }
 0x587   :  { %v2987_v40 = vpop.eup %2986 }
 0x588   :  { %v1458_v41 = vsel %vm121_vm0, %v2987_v40, 0.0  ;;  %v2989_v43 = vpop.eup %2988 }
 0x589   :  { %1459 = vadd.xlane.f32.xlu0 %v1458_v41  ;;  %1450 = vadd.xlane.f32.xlu1 %v1449_v42  ;;  %v1455_v44 = vsel %vm121_vm0, %v2989_v43, 0.0  ;;  %v2991_v1 = vpop.eup %2990 }
 0x58a   :  { %v2993_v5 = vpop.eup %2992 }
 0x58b   :  { %v2995_v9 = vpop.eup %2994 }
 0x58c   :  { %v2997_v14 = vpop.eup %2996 }
 0x58d   :  { %1456 = vadd.xlane.f32.xlu0 %v1455_v44 }
 0x59a   :  { %1758 = vrot.lane.b32.xlu1 %v3382_v7, %s3212_s4 }
 0x59e   :  { %1754 = vrot.lane.b32.xlu1 %v3357_v56, %s3212_s4 }
 0x5a2   :  { %1756 = vrot.lane.b32.xlu1 %v3396_v13, %s3212_s4 }
 0x5a3   :  { %1667 = vrot.lane.b32.xlu0 %v3375_v4, %s3212_s4 }
 0x5a7   :  { %1663 = vrot.lane.b32.xlu0 %v3352_v52, %s3212_s4 }
 0x5ab   :  { %1665 = vrot.lane.b32.xlu0 %v3389_v10, %s3212_s4 }
 0x60e   :  { %v1454_v63 = vpop.xlane.xlu1 %1453 }
 0x60f   :  { %v1474_v3 = vadd.f32 %v2991_v1, %v1454_v63 }
 0x611   :  { %2998 = vrcp.f32 %v1474_v3 }
 0x612   :  { %v1460_v6 = vpop.xlane.xlu0 %1459  ;;  %v1451_v8 = vpop.xlane.xlu1 %1450 }
 0x613   :  { %v1473_v11 = vadd.f32 %v2993_v5, %v1451_v8  ;;  %v1476_v12 = vadd.f32 %v2995_v9, %v1460_v6 }
 0x615   :  { %3000 = vrcp.f32 %v1473_v11 }
 0x616   :  { %v1457_v15 = vpop.xlane.xlu0 %1456  ;;  %3002 = vrcp.f32 %v1476_v12  ;;  %v1759_v20 = vpop.permute.xlu1 %1758 }
 0x617   :  { %v1475_v16 = vadd.f32 %v2997_v14, %v1457_v15 }
 0x619   :  { %3004 = vrcp.f32 %v1475_v16 }
 0x61a   :  { %v1668_v17 = vpop.permute.xlu0 %1667  ;;  %v1755_v28 = vpop.permute.xlu1 %1754 }
 0x61e   :  { %v2999_v18 = vpop.eup %2998  ;;  %v1664_v25 = vpop.permute.xlu0 %1663 }
 0x61f   :  { %v1482_v23 = vmul.f32 %v2999_v18, %v2983_v37  ;;  %v1757_v30 = vpop.permute.xlu1 %1756 }
 0x622   :  { %v3001_v19 = vpop.eup %3000  ;;  %v1666_v29 = vpop.permute.xlu0 %1665 }
 0x623   :  { %v1481_v21 = vmul.f32 %v3001_v19, %v2985_v39  ;;  %v3003_v22 = vpop.eup %3002 }
 0x624   :  { %v1484_v27 = vmul.f32 %v3003_v22, %v2987_v40 }
 0x625   :  { %2878 = vmatprep.mubr.msk.f32.mxu0 %vm121_vm0, %v1481_v21 }
 0x626   :  { %v3005_v24 = vpop.eup %3004  ;;  %2879 = vmatmul.mubr.msk.f32.vlgmr.msra.gmra.mxu0 %vm121_vm0, %v1482_v23 }
 0x627   :  { %v1483_v26 = vmul.f32 %v3005_v24, %v2989_v43  ;;  %2889 = vmatpush3.xpose.msk.msra.mxu0 %vm830_vm1, %v3511_v35  ;;  %2892 = vmatprep.mubr.msk.f32.mxu0 %vm830_vm1, %v1664_v25 }
 0x628   :  { %2890 = vmatprep.subr.msk.mxu0 %vm830_vm1, %v1668_v17 }
 0x629   :  { %2885 = vmatprep.mubr.msk.f32.mxu1 %vm121_vm0, %v1483_v26 }
 0x62a   :  { %2886 = vmatmul.mubr.msk.f32.vlgmr.msra.gmra.mxu1 %vm121_vm0, %v1484_v27 }
 0x62b   :  { %2896 = vmatpush3.xpose.msk.msra.mxu1 %vm830_vm1, %v3515_v36  ;;  %2899 = vmatprep.mubr.msk.f32.mxu1 %vm830_vm1, %v1755_v28 }
 0x62c   :  { %2891 = vmatpush3.xpose.msk.msra.mxu0 %vm830_vm1, %v1668_v17  ;;  %2897 = vmatprep.subr.msk.mxu1 %vm830_vm1, %v1759_v20 }
 0x62f   :  { %2893 = vmatmul.mubr.msk.f32.vlgmr.msra.gmra.mxu0 %vm830_vm1, %v1666_v29  ;;  %2898 = vmatpush3.xpose.msk.msra.mxu1 %vm830_vm1, %v1759_v20 }
 0x632   :  { %2900 = vmatmul.mubr.msk.f32.vlgmr.msra.gmra.mxu1 %vm830_vm1, %v1757_v30 }
 0x6e6   :  { %v3551_v31 = vpop.f32.mrf.mxu0 }
 0x6e8   :  { %v3555_v33 = vpop.f32.mrf.mxu0 }
 0x6ea   :  { %v3553_v32 = vpop.f32.mrf.mxu1 }
 0x6ec   :  { %v3557_v35 = vpop.f32.mrf.mxu1 }
 0x6ef   :  { %v2894_v34 = vpop.f32.mrf.mxu0 }
 0x6f0   :  { %v1846_v39 = vmul.f32 0.35355338, %v2894_v34 }
 0x6f1   :  { %v1745_v36 = vpop.f32.mrf.mxu0 }
 0x6f2   :  { %v1845_v37 = vmul.f32 0.35355338, %v1745_v36  ;;  %v2901_v38 = vpop.f32.mrf.mxu1  ;;  %v1852_v46 = vsel %vm121_vm0, %v1846_v39, -inf }
 0x6f3   :  { %v1848_v44 = vmul.f32 0.35355338, %v2901_v38 }
 0x6f4   :  { %v1849_v40 = vsel %vm121_vm0, %v1845_v37, -inf  ;;  %v1836_v41 = vpop.f32.mrf.mxu1 }
 0x6f5   :  { %1850 = vmax.xlane.f32.xlu0 %v1849_v40  ;;  %v1847_v42 = vmul.f32 0.35355338, %v1836_v41  ;;  %v1858_v47 = vsel %vm121_vm0, %v1848_v44, -inf }
 0x6f7   :  { %v1855_v43 = vsel %vm121_vm0, %v1847_v42, -inf }
 0x6f8   :  { %1856 = vmax.xlane.f32.xlu1 %v1855_v43 }
 0x6f9   :  { %1853 = vmax.xlane.f32.xlu0 %v1852_v46 }
 0x6fd   :  { %1859 = vmax.xlane.f32.xlu0 %v1858_v47 }
 0x709   :  { %1915 = vrot.lane.b32.xlu1 %v3424_v45, %s3212_s4 }
 0x70d   :  { %1913 = vrot.lane.b32.xlu1 %v3431_v55, %s3212_s4 }
 0x711   :  { %2000 = vrot.lane.b32.xlu1 %v3439_v2, %s3212_s4 }
 0x713   :  { %2002 = vrot.lane.b32.xlu0 %v3434_v62, %s3212_s4 }
 0x715   :  { %2184 = vrot.lane.b32.xlu1 %v3368_v0, %s3215_s8 }
 0x717   :  { %2093 = vrot.lane.b32.xlu0 %v3365_v61, %s3215_s8 }
 0x77e   :  { %v1851_v48 = vpop.xlane.xlu0 %1850 }
 0x77f   :  { %v1861_v49 = vmax.f32 %v1851_v48, 0.0 }
 0x781   :  { %v1857_v50 = vpop.xlane.xlu1 %1856  ;;  %v1865_v58 = vsub.f32 %v1845_v37, %v1861_v49  ;;  %v1889_v28 = vsub.f32 0.0, %v1861_v49 }
 0x782   :  { %v1854_v51 = vpop.xlane.xlu0 %1853  ;;  %v1863_v63 = vmax.f32 %v1857_v50, 0.0 }
 0x783   :  { %v1862_v60 = vmax.f32 %v1854_v51, 0.0  ;;  %v1869_v6 = vmul.f32 1.442695, %v1865_v58 }
 0x784   :  { %v1867_v9 = vsub.f32 %v1847_v42, %v1863_v63  ;;  %v1891_v34 = vsub.f32 0.0, %v1863_v63 }
 0x785   :  { %v1866_v1 = vsub.f32 %v1846_v39, %v1862_v60  ;;  %v1916_v3 = vpop.permute.xlu1 %1915  ;;  %v1890_v27 = vsub.f32 0.0, %v1862_v60 }
 0x786   :  { %v1860_v5 = vpop.xlane.xlu0 %1859  ;;  %2902 = vmatprep.subr.mxu0 %v1916_v3  ;;  %v1873_v14 = vmul.f32 1.442695, %v1867_v9 }
 0x787   :  { %v1871_v8 = vmul.f32 1.442695, %v1866_v1  ;;  %v1864_v11 = vmax.f32 %v1860_v5, 0.0  ;;  %2903 = vmatpush3.msra.mxu0 %v1916_v3  ;;  %v1895_v30 = vmul.f32 1.442695, %v1890_v27 }
 0x789   :  { %3006 = vpow2.f32 %v1871_v8  ;;  %v1868_v0 = vsub.f32 %v1848_v44, %v1864_v11  ;;  %v1914_v12 = vpop.permute.xlu1 %1913  ;;  %v1892_v29 = vsub.f32 0.0, %v1864_v11 }
 0x78a   :  { %v2003_v61 = vpop.permute.xlu0 %2002  ;;  %2904 = vmatprep.subr.mxu0 %v1914_v12  ;;  %3008 = vpow2.f32 %v1869_v6 }
 0x78b   :  { %v1875_v15 = vmul.f32 1.442695, %v1868_v0  ;;  %2909 = vmatprep.subr.mxu1 %v2003_v61  ;;  %2905 = vmatpush3.msra.mxu0 %v1914_v12  ;;  %v1899_v36 = vmul.f32 1.442695, %v1892_v29 }
 0x78c   :  { %2910 = vmatpush3.msra.mxu1 %v2003_v61 }
 0x78d   :  { %3010 = vpow2.f32 %v1875_v15  ;;  %v2001_v16 = vpop.permute.xlu1 %2000 }
 0x78e   :  { %v3575_v17 = vpop.permute.xlu0 %2093  ;;  %2911 = vmatprep.subr.mxu1 %v2001_v16  ;;  %3012 = vpow2.f32 %v1873_v14 }
 0x78f   :  { %2916 = vmatprep.subr.msk.mxu0 %vm830_vm1, %v3575_v17  ;;  %2912 = vmatpush3.msra.mxu1 %v2001_v16  ;;  %3014 = vpow2.f32 %v1895_v30 }
 0x791   :  { %v3579_v18 = vpop.permute.xlu1 %2184 }
 0x792   :  { %2923 = vmatprep.subr.msk.mxu1 %vm830_vm1, %v3579_v18 }
 0x796   :  { %v3007_v19 = vpop.eup %3006 }
 0x797   :  { %v1880_v20 = vsel %vm121_vm0, %v3007_v19, 0.0  ;;  %v3009_v21 = vpop.eup %3008 }
 0x798   :  { %1881 = vadd.xlane.f32.xlu1 %v1880_v20  ;;  %v1877_v24 = vsel %vm121_vm0, %v3009_v21, 0.0 }
 0x79a   :  { %v3011_v22 = vpop.eup %3010 }
 0x79b   :  { %v1886_v23 = vsel %vm121_vm0, %v3011_v22, 0.0  ;;  %v3013_v25 = vpop.eup %3012 }
 0x79c   :  { %1887 = vadd.xlane.f32.xlu0 %v1886_v23  ;;  %1878 = vadd.xlane.f32.xlu1 %v1877_v24  ;;  %v1883_v26 = vsel %vm121_vm0, %v3013_v25, 0.0 }
 0x7a0   :  { %1884 = vadd.xlane.f32.xlu0 %v1883_v26 }
 0x7ad   :  { %2182 = vrot.lane.b32.xlu1 %v3382_v7, %s3215_s8  ;;  %v1893_v7 = vmul.f32 1.442695, %v1889_v28 }
 0x7af   :  { %3016 = vpow2.f32 %v1893_v7 }
 0x7b0   :  { %3018 = vpow2.f32 %v1899_v36 }
 0x7b1   :  { %2178 = vrot.lane.b32.xlu1 %v3357_v56, %s3215_s8  ;;  %v1897_v56 = vmul.f32 1.442695, %v1891_v34 }
 0x7b3   :  { %3020 = vpow2.f32 %v1897_v56 }
 0x7b5   :  { %2180 = vrot.lane.b32.xlu1 %v3396_v13, %s3215_s8 }
 0x7b6   :  { %2091 = vrot.lane.b32.xlu0 %v3375_v4, %s3215_s8  ;;  %v3015_v4 = vpop.eup %3014 }
 0x7ba   :  { %2087 = vrot.lane.b32.xlu0 %v3352_v52, %s3215_s8 }
 0x7bc   :  { %v3017_v38 = vpop.eup %3016 }
 0x7bd   :  { %v3019_v40 = vpop.eup %3018 }
 0x7be   :  { %2089 = vrot.lane.b32.xlu0 %v3389_v10, %s3215_s8 }
 0x7c0   :  { %v3021_v42 = vpop.eup %3020 }
 0x821   :  { %v1882_v13 = vpop.xlane.xlu1 %1881 }
 0x822   :  { %v1902_v37 = vadd.f32 %v3015_v4, %v1882_v13 }
 0x824   :  { %3022 = vrcp.f32 %v1902_v37 }
 0x825   :  { %v1888_v52 = vpop.xlane.xlu0 %1887  ;;  %v1879_v39 = vpop.xlane.xlu1 %1878 }
 0x826   :  { %v1901_v10 = vadd.f32 %v3017_v38, %v1879_v39  ;;  %v1904_v41 = vadd.f32 %v3019_v40, %v1888_v52 }
 0x828   :  { %3024 = vrcp.f32 %v1901_v10 }
 0x829   :  { %v1885_v43 = vpop.xlane.xlu0 %1884  ;;  %3026 = vrcp.f32 %v1904_v41  ;;  %v2183_v49 = vpop.permute.xlu1 %2182 }
 0x82a   :  { %v1903_v44 = vadd.f32 %v3021_v42, %v1885_v43 }
 0x82c   :  { %3028 = vrcp.f32 %v1903_v44 }
 0x82d   :  { %v2092_v46 = vpop.permute.xlu0 %2091  ;;  %v2179_v5 = vpop.permute.xlu1 %2178 }
 0x831   :  { %v3023_v47 = vpop.eup %3022  ;;  %v2088_v63 = vpop.permute.xlu0 %2087 }
 0x832   :  { %v1910_v58 = vmul.f32 %v3023_v47, %v3007_v19  ;;  %v2181_v8 = vpop.permute.xlu1 %2180 }
 0x835   :  { %v3025_v48 = vpop.eup %3024  ;;  %v2090_v6 = vpop.permute.xlu0 %2089 }
 0x836   :  { %v1909_v50 = vmul.f32 %v3025_v48, %v3009_v21  ;;  %v3027_v51 = vpop.eup %3026 }
 0x837   :  { %v1912_v3 = vmul.f32 %v3027_v51, %v3011_v22 }
 0x838   :  { %2906 = vmatprep.mubr.msk.f32.mxu0 %vm121_vm0, %v1909_v50 }
 0x839   :  { %v3029_v60 = vpop.eup %3028  ;;  %2907 = vmatmul.mubr.msk.f32.vlgmr.msra.gmra.mxu0 %vm121_vm0, %v1910_v58 }
 0x83a   :  { %v1911_v1 = vmul.f32 %v3029_v60, %v3013_v25  ;;  %2917 = vmatpush3.xpose.msk.msra.mxu0 %vm830_vm1, %v3575_v17  ;;  %2920 = vmatprep.mubr.msk.f32.mxu0 %vm830_vm1, %v2088_v63 }
 0x83b   :  { %2918 = vmatprep.subr.msk.mxu0 %vm830_vm1, %v2092_v46 }
 0x83c   :  { %2913 = vmatprep.mubr.msk.f32.mxu1 %vm121_vm0, %v1911_v1 }
 0x83d   :  { %2914 = vmatmul.mubr.msk.f32.vlgmr.msra.gmra.mxu1 %vm121_vm0, %v1912_v3 }
 0x83e   :  { %2924 = vmatpush3.xpose.msk.msra.mxu1 %vm830_vm1, %v3579_v18  ;;  %2927 = vmatprep.mubr.msk.f32.mxu1 %vm830_vm1, %v2179_v5 }
 0x83f   :  { %2919 = vmatpush3.xpose.msk.msra.mxu0 %vm830_vm1, %v2092_v46  ;;  %2925 = vmatprep.subr.msk.mxu1 %vm830_vm1, %v2183_v49 }
 0x842   :  { %2921 = vmatmul.mubr.msk.f32.vlgmr.msra.gmra.mxu0 %vm830_vm1, %v2090_v6  ;;  %2926 = vmatpush3.xpose.msk.msra.mxu1 %vm830_vm1, %v2183_v49 }
 0x845   :  { %2928 = vmatmul.mubr.msk.f32.vlgmr.msra.gmra.mxu1 %vm830_vm1, %v2181_v8 }
 0x8f9   :  { %v2908_v9 = vpop.f32.mrf.mxu0 }
 0x8fb   :  { %v1991_v0 = vpop.f32.mrf.mxu0 }
 0x8fd   :  { %v2915_v11 = vpop.f32.mrf.mxu1 }
 0x8ff   :  { %v2078_v61 = vpop.f32.mrf.mxu1 }
 0x902   :  { %v2922_v12 = vpop.f32.mrf.mxu0 }
 0x903   :  { %v2270_v17 = vmul.f32 0.35355338, %v2922_v12 }
 0x904   :  { %v2169_v14 = vpop.f32.mrf.mxu0 }
 0x905   :  { %v2269_v15 = vmul.f32 0.35355338, %v2169_v14  ;;  %v2929_v16 = vpop.f32.mrf.mxu1  ;;  %v2276_v23 = vsel %vm121_vm0, %v2270_v17, -inf }
 0x906   :  { %v2272_v22 = vmul.f32 0.35355338, %v2929_v16 }
 0x907   :  { %v2273_v18 = vsel %vm121_vm0, %v2269_v15, -inf  ;;  %v2260_v19 = vpop.f32.mrf.mxu1 }
 0x908   :  { %2274 = vmax.xlane.f32.xlu0 %v2273_v18  ;;  %v2271_v20 = vmul.f32 0.35355338, %v2260_v19  ;;  %v2282_v24 = vsel %vm121_vm0, %v2272_v22, -inf }
 0x90a   :  { %v2279_v21 = vsel %vm121_vm0, %v2271_v20, -inf }
 0x90b   :  { %2280 = vmax.xlane.f32.xlu1 %v2279_v21 }
 0x90c   :  { %2277 = vmax.xlane.f32.xlu0 %v2276_v23 }
 0x910   :  { %2283 = vmax.xlane.f32.xlu0 %v2282_v24 }
 0x91c   :  { %2339 = vrot.lane.b32.xlu1 %v3424_v45, %s3215_s8 }
 0x991   :  { %v2275_v25 = vpop.xlane.xlu0 %2274 }
 0x992   :  { %v2285_v26 = vmax.f32 %v2275_v25, 0.0 }
 0x994   :  { %v2281_v27 = vpop.xlane.xlu1 %2280  ;;  %v2289_v29 = vsub.f32 %v2269_v15, %v2285_v26 }
 0x995   :  { %v2278_v28 = vpop.xlane.xlu0 %2277  ;;  %v2287_v7 = vmax.f32 %v2281_v27, 0.0 }
 0x996   :  { %v2286_v30 = vmax.f32 %v2278_v28, 0.0  ;;  %v2293_v13 = vmul.f32 1.442695, %v2289_v29 }
 0x997   :  { %v2291_v37 = vsub.f32 %v2271_v20, %v2287_v7 }
 0x998   :  { %v2290_v34 = vsub.f32 %v2270_v17, %v2286_v30  ;;  %v2340_v36 = vpop.permute.xlu1 %2339 }
 0x999   :  { %v2284_v56 = vpop.xlane.xlu0 %2283  ;;  %2930 = vmatprep.subr.mxu0 %v2340_v36  ;;  %v2297_v45 = vmul.f32 1.442695, %v2291_v37 }
 0x99a   :  { %v2295_v4 = vmul.f32 1.442695, %v2290_v34  ;;  %v2288_v38 = vmax.f32 %v2284_v56, 0.0  ;;  %2931 = vmatpush3.msra.mxu0 %v2340_v36 }
 0x99c   :  { %3030 = vpow2.f32 %v2295_v4  ;;  %v2292_v52 = vsub.f32 %v2272_v22, %v2288_v38 }
 0x99d   :  { %3032 = vpow2.f32 %v2293_v13 }
 0x99e   :  { %v2299_v39 = vmul.f32 1.442695, %v2292_v52 }
 0x9a0   :  { %3034 = vpow2.f32 %v2299_v39 }
 0x9a1   :  { %3036 = vpow2.f32 %v2297_v45 }
 0x9a9   :  { %v3621_v40 = vpop.eup %3030 }
 0x9aa   :  { %v2304_v10 = vsel %vm121_vm0, %v3621_v40, 0.0  ;;  %v3033_v41 = vpop.eup %3032 }
 0x9ab   :  { %2305 = vadd.xlane.f32.xlu1 %v2304_v10  ;;  %v2301_v44 = vsel %vm121_vm0, %v3033_v41, 0.0 }
 0x9ad   :  { %v3625_v42 = vpop.eup %3034 }
 0x9ae   :  { %v2310_v43 = vsel %vm121_vm0, %v3625_v42, 0.0  ;;  %v3037_v46 = vpop.eup %3036 }
 0x9af   :  { %2311 = vadd.xlane.f32.xlu0 %v2310_v43  ;;  %2302 = vadd.xlane.f32.xlu1 %v2301_v44  ;;  %v2307_v47 = vsel %vm121_vm0, %v3037_v46, 0.0 }
 0x9b3   :  { %2308 = vadd.xlane.f32.xlu0 %v2307_v47 }
 0x9c0   :  { %2337 = vrot.lane.b32.xlu1 %v3431_v55, %s3215_s8  ;;  %v2314_v55 = vsub.f32 0.0, %v2286_v30 }
 0x9c4   :  { %2424 = vrot.lane.b32.xlu1 %v3439_v2, %s3215_s8  ;;  %v2313_v2 = vsub.f32 0.0, %v2285_v26 }
 0x9c6   :  { %v2317_v48 = vmul.f32 1.442695, %v2313_v2 }
 0x9c8   :  { %2517 = vrot.lane.b32.xlu1 %v3551_v31, %s3207_s15  ;;  %v2319_v31 = vmul.f32 1.442695, %v2314_v55 }
 0x9c9   :  { %2426 = vrot.lane.b32.xlu0 %v3434_v62, %s3215_s8  ;;  %v2316_v62 = vsub.f32 0.0, %v2288_v38 }
 0x9ca   :  { %3038 = vpow2.f32 %v2319_v31 }
 0x9cb   :  { %v2323_v49 = vmul.f32 1.442695, %v2316_v62  ;;  %3040 = vpow2.f32 %v2317_v48 }
 0x9cc   :  { %2521 = vrot.lane.b32.xlu1 %v3553_v32, %s3207_s15  ;;  %v2315_v32 = vsub.f32 0.0, %v2287_v7 }
 0x9cd   :  { %2515 = vrot.lane.b32.xlu0 %v3555_v33, %s3207_s15  ;;  %3042 = vpow2.f32 %v2323_v49 }
 0x9ce   :  { %v2321_v33 = vmul.f32 1.442695, %v2315_v32 }
 0x9d0   :  { %2533 = vrot.lane.b32.xlu1 %v2908_v9, %s3213_s5  ;;  %3044 = vpow2.f32 %v2321_v33 }
 0x9d1   :  { %2519 = vrot.lane.b32.xlu0 %v3557_v35, %s3207_s15 }
 0x9d4   :  { %2537 = vrot.lane.b32.xlu1 %v2915_v11, %s3213_s5 }
 0x9d5   :  { %2531 = vrot.lane.b32.xlu0 %v1991_v0, %s3213_s5 }
 0x9d7   :  { %v3039_v35 = vpop.eup %3038 }
 0x9d8   :  { %v3041_v58 = vpop.eup %3040 }
 0x9d9   :  { %2535 = vrot.lane.b32.xlu0 %v2078_v61, %s3213_s5 }
 0x9da   :  { %v3043_v1 = vpop.eup %3042 }
 0x9dd   :  { %v3045_v6 = vpop.eup %3044 }
 0xa34   :  { %v2306_v50 = vpop.xlane.xlu1 %2305 }
 0xa35   :  { %v2326_v51 = vadd.f32 %v3039_v35, %v2306_v50 }
 0xa37   :  { %3046 = vrcp.f32 %v2326_v51 }
 0xa38   :  { %v2312_v60 = vpop.xlane.xlu0 %2311  ;;  %v2303_v63 = vpop.xlane.xlu1 %2302 }
 0xa39   :  { %v2325_v3 = vadd.f32 %v3041_v58, %v2303_v63  ;;  %v2328_v5 = vadd.f32 %v3043_v1, %v2312_v60 }
 0xa3b   :  { %3048 = vrcp.f32 %v2325_v3 }
 0xa3c   :  { %v2309_v8 = vpop.xlane.xlu0 %2308  ;;  %v2338_v9 = vpop.permute.xlu1 %2337  ;;  %3050 = vrcp.f32 %v2328_v5 }
 0xa3d   :  { %v2327_v11 = vadd.f32 %v3045_v6, %v2309_v8  ;;  %2932 = vmatprep.subr.mxu0 %v2338_v9 }
 0xa3e   :  { %2933 = vmatpush3.msra.mxu0 %v2338_v9 }
 0xa3f   :  { %3052 = vrcp.f32 %v2327_v11 }
 0xa40   :  { %v2427_v0 = vpop.permute.xlu0 %2426  ;;  %v2425_v12 = vpop.permute.xlu1 %2424 }
 0xa41   :  { %2937 = vmatprep.subr.mxu1 %v2427_v0 }
 0xa42   :  { %2938 = vmatpush3.msra.mxu1 %v2427_v0 }
 0xa43   :  { %2939 = vmatprep.subr.mxu1 %v2425_v12 }
 0xa44   :  { %2940 = vmatpush3.msra.mxu1 %v2425_v12  ;;  %v3047_v61 = vpop.eup %3046  ;;  %v2518_v25 = vpop.permute.xlu1 %2517 }
 0xa45   :  { %v2334_v17 = vmul.f32 %v3047_v61, %v3621_v40  ;;  %v2516_v26 = vpop.permute.xlu0 %2515  ;;  %v2560_v36 = vsel %vm830_vm1, %v3487_v53, %v2518_v25 }
 0xa46   :  { %v2559_v4 = vsel %vm830_vm1, %v3491_v57, %v2516_v26 }
 0xa48   :  { %v3049_v14 = vpop.eup %3048  ;;  %v2522_v27 = vpop.permute.xlu1 %2521 }
 0xa49   :  { %v2333_v15 = vmul.f32 %v3049_v14, %v3033_v41  ;;  %v3051_v16 = vpop.eup %3050  ;;  %v2520_v28 = vpop.permute.xlu0 %2519  ;;  %v2562_v45 = vsel %vm830_vm1, %v3489_v54, %v2522_v27 }
 0xa4a   :  { %v2336_v20 = vmul.f32 %v3051_v16, %v3625_v42  ;;  %v2561_v57 = vsel %vm830_vm1, %v3493_v59, %v2520_v28 }
 0xa4b   :  { %2934 = vmatprep.mubr.msk.f32.mxu0 %vm121_vm0, %v2333_v15 }
 0xa4c   :  { %v3053_v18 = vpop.eup %3052  ;;  %2935 = vmatmul.mubr.msk.f32.vlgmr.msra.gmra.mxu0 %vm121_vm0, %v2334_v17  ;;  %v2534_v29 = vpop.permute.xlu1 %2533 }
 0xa4d   :  { %v2335_v19 = vmul.f32 %v3053_v18, %v3037_v46  ;;  %v2532_v30 = vpop.permute.xlu0 %2531  ;;  %v2564_v56 = vsel %vm121_vm0, %v2560_v36, %v2534_v29 }
 0xa4e   :  { %v2563_v38 = vsel %vm121_vm0, %v2559_v4, %v2532_v30 }
 0xa4f   :  { %2941 = vmatprep.mubr.msk.f32.mxu1 %vm121_vm0, %v2335_v19 }
 0xa50   :  { %2942 = vmatmul.mubr.msk.f32.vlgmr.msra.gmra.mxu1 %vm121_vm0, %v2336_v20  ;;  %v2538_v7 = vpop.permute.xlu1 %2537 }
 0xa51   :  { %v2536_v34 = vpop.permute.xlu0 %2535  ;;  %v2566_v53 = vsel %vm121_vm0, %v2562_v45, %v2538_v7 }
 0xa52   :  { %v2565_v41 = vsel %vm121_vm0, %v2561_v57, %v2536_v34 }
 0xb0c   :  { %v2936_v21 = vpop.f32.mrf.mxu0 }
 0xb0d   :  { %2549 = vrot.lane.b32.xlu1 %v2936_v21, %s3216_s23 }
 0xb0e   :  { %v2415_v22 = vpop.f32.mrf.mxu0 }
 0xb0f   :  { %2547 = vrot.lane.b32.xlu0 %v2415_v22, %s3216_s23 }
 0xb10   :  { %v2943_v23 = vpop.f32.mrf.mxu1 }
 0xb11   :  { %2553 = vrot.lane.b32.xlu1 %v2943_v23, %s3216_s23 }
 0xb12   :  { %v2502_v24 = vpop.f32.mrf.mxu1 }
 0xb13   :  { %2551 = vrot.lane.b32.xlu0 %v2502_v24, %s3216_s23 }
 0xb7f   :  { %v2550_v13 = vpop.permute.xlu1 %2549 }
 0xb80   :  { %v2569_v37 = vsel %vm2567_vm2, %v2564_v56, %v2550_v13 }
 0xb81   :  { %2574 = vst.msk [vmem:[#allocation13 + $0x8] sm:$0xff] %vm2572_vm3, %v2569_v37  ;;  %v2548_v52 = vpop.permute.xlu0 %2547 }
 0xb82   :  { %v2568_v39 = vsel %vm2567_vm2, %v2563_v38, %v2548_v52 }
 0xb83   :  { %2573 = vst.msk [vmem:[#allocation13] sm:$0xff] %vm2572_vm3, %v2568_v39  ;;  %v2554_v40 = vpop.permute.xlu1 %2553 }
 0xb84   :  { %v2571_v10 = vsel %vm2567_vm2, %v2566_v53, %v2554_v40 }
 0xb85   :  { %2576 = vst.msk [vmem:[#allocation13 + $0x18] sm:$0xff] %vm2572_vm3, %v2571_v10  ;;  %v2552_v42 = vpop.permute.xlu0 %2551 }
 0xb86   :  { %v2570_v54 = vsel %vm2567_vm2, %v2565_v41, %v2552_v42 }
 0xb87   :  { %2575 = vst.msk [vmem:[#allocation13 + $0x10] sm:$0xff] %vm2572_vm3, %v2570_v54 }
 0xb88   :  { %3185 = shalt.err (!%p3182_p6)
}
 0xb89   :  { %2588 = dma.vmem_to_hbm [thread:$0]  %s2583_s1, 512, %s3690_s9, [#allocation4], %s3206_s14, %s3206_s14, %s3207_s15  }
 0xb8a   :  { %3202 = dma.done.wait [#allocation4], 512  }
 0xb8b   :  { %3203 = vsyncadd [#allocation4], 4294966784 }
 0xb8c   :  { %2592 = vsyncpa [#allocation3], 1 }
 0xb8d   :  { %2593 = vsyncpa [#allocation6], 1 }
 0xb8e   :  { %2594 = vsyncpa [#allocation9], 1 }
 0xb8f   :  { %2595 = vsyncpa [#allocation12], 1 }
 0xb90   :  { %2596 = vsyncpa [#allocation4], 1 }

</bundles_post_ra>
